<compile_context>
chip_gen: v7x
topology: tpu7x:2x2x1
jax: 0.10.0
libtpu: 0.0.40
codegen_flags: <defaults>
</compile_context>

<pallas_src>
import functools

import jax
import jax.numpy as jnp
from jax import lax
from jax.experimental import pallas as pl
from jax.experimental.pallas import tpu as pltpu

jax.config.update("jax_default_matmul_precision", "float32")

NUM_INPUTS = 2
NUM_HIDDEN = 200
NUM_OUTPUT = 1
THRESHOLD = 1.0

H_PAD = 256          # hidden dim padded to a lane multiple (2 x 128)
BB = 8               # batch block == f32 sublane count

NUM_E = round(0.8 * NUM_HIDDEN)          # 160
NUM_I = NUM_HIDDEN - NUM_E               # 40
NUM_PV = round(0.4 * NUM_I)              # 16
NUM_SST = round(0.3 * NUM_I)             # 12
NUM_HTR = NUM_I - NUM_SST - NUM_PV       # 12

P_NN = {'e_e': 0.16, 'e_PV': 0.395, 'e_Sst': 0.182, 'e_Htr': 0.105,
        'PV_e': 0.411, 'PV_PV': 0.451, 'PV_Sst': 0.03, 'PV_Htr': 0.22,
        'Sst_e': 0.424, 'Sst_PV': 0.857, 'Sst_Sst': 0.082, 'Sst_Htr': 0.77,
        'Htr_e': 0.087, 'Htr_PV': 0.02, 'Htr_Sst': 0.0625, 'Htr_Htr': 0.028}


# ----------------------------------------------------------------------------
# Pallas kernel: one grid step == `tb` time steps of the spiking recurrence for
# one batch block of 8 sequences.
# ----------------------------------------------------------------------------
def rsnn_kernel(cur1_ref, wr_ref, br_ref, beta_ref, spk_ref, mem_sc, spk_sc,
                *, tb, unroll):
    # Initialize hidden state (init_rleaky -> zeros) at the first time block of every
    # batch block (time is the inner "arbitrary" grid axis, so it restarts per batch
    # block and per TensorCore under megacore sharding).
    @pl.when(pl.program_id(1) == 0)
    def _():
        mem_sc[...] = jnp.zeros_like(mem_sc)
        spk_sc[...] = jnp.zeros_like(spk_sc)

    # Hoisted loop-invariant loads: already broadcast to (BB, H_PAD) in the wrapper,
    # so no per-step broadcast_in_dim and no per-step VMEM load for these.
    beta = beta_ref[...]       # (BB, H_PAD) f32
    br = br_ref[...]           # (BB, H_PAD) f32

    def step(i, carry):
        spk_prev, mem_prev = carry                    # vreg-resident state

        # Recurrent projection on the MXU: single bf16 pass (spikes are exactly 0/1,
        # wr is already bf16).  f32 accumulation via preferred_element_type.
        rec = jnp.dot(spk_prev.astype(jnp.bfloat16), wr_ref[...],
                      precision=lax.Precision.DEFAULT,
                      preferred_element_type=jnp.float32)

        base = beta * mem_prev + cur1_ref[i] + rec + br
        # reset_mechanism='zero': reset = heaviside(mem_prev - thr) == spk_prev.
        mem_new = jnp.where(spk_prev == 0.0, base, 0.0)
        spk_new = (mem_new > THRESHOLD).astype(jnp.float32)

        spk_ref[i] = spk_new                          # f32 lane-dense store
        return spk_new, mem_new

    # Partial unroll keeps an LLO scheduling window without code-size blowup at big tb.
    spk_f, mem_f = lax.fori_loop(0, tb, step, (spk_sc[...], mem_sc[...]),
                                 unroll=unroll)

    # Write the carried state back to scratch once per block.
    spk_sc[...] = spk_f
    mem_sc[...] = mem_f


def rsnn2_forward(x, w1, b1, wr, br, beta, w2, b2, *, tb=64):
    T, B, _ = x.shape
    H = NUM_HIDDEN

    # --- Zero-pad parameters to H_PAD (padded neurons get cur=0, never spike).
    w1_p = jnp.zeros((NUM_INPUTS, H_PAD), jnp.float32).at[:, :H].set(w1)
    b1_p = jnp.zeros((1, H_PAD), jnp.float32).at[:, :H].set(b1)
    wr_p = jnp.zeros((H_PAD, H_PAD), jnp.float32).at[:H, :H].set(wr)
    br_p = jnp.zeros((1, H_PAD), jnp.float32).at[:, :H].set(br)
    beta_p = jnp.zeros((1, H_PAD), jnp.float32).at[:, :H].set(beta)

    # bf16 RHS for the recurrent MXU matmul (cuts MXU passes 3-6x).  Exact when wr is
    # bf16-representable (make_params snaps it); otherwise <= 2^-9 relative rounding.
    wr_bf16 = wr_p.astype(jnp.bfloat16)
    # Pre-broadcast per-neuron vectors to a full (BB, H_PAD) tile.
    br_b = jnp.broadcast_to(br_p, (BB, H_PAD))
    beta_b = jnp.broadcast_to(beta_p, (BB, H_PAD))

    # --- Hoisted l1: one (T*B, 2) @ (2, 256) XLA matmul outside the loop.
    cur1 = (x.reshape(T * B, NUM_INPUTS) @ w1_p + b1_p).reshape(T, B, H_PAD)

    # --- Tune the time block down for tiny sequences, then pad T and B.
    tb = int(min(tb, 8 * (-(-T // 8))))
    T_pad = tb * (-(-T // tb))
    B_pad = BB * (-(-B // BB))
    cur1 = jnp.pad(cur1, ((0, T_pad - T), (0, B_pad - B), (0, 0)))

    unroll = int(min(8, tb))

    grid_spec = pltpu.PrefetchScalarGridSpec(
        num_scalar_prefetch=0,
        grid=(B_pad // BB, T_pad // tb),          # (batch blocks, time blocks)
        in_specs=[
            pl.BlockSpec((tb, BB, H_PAD), lambda b, t: (t, b, 0)),   # cur1
            pl.BlockSpec((H_PAD, H_PAD), lambda b, t: (0, 0)),       # wr (bf16)
            pl.BlockSpec((BB, H_PAD), lambda b, t: (0, 0)),          # br (pre-broadcast)
            pl.BlockSpec((BB, H_PAD), lambda b, t: (0, 0)),          # beta (pre-broadcast)
        ],
        out_specs=pl.BlockSpec((tb, BB, H_PAD), lambda b, t: (t, b, 0)),
        scratch_shapes=[
            pltpu.VMEM((BB, H_PAD), jnp.float32),   # mem state
            pltpu.VMEM((BB, H_PAD), jnp.float32),   # spk state
        ],
    )
    spk_padded = pl.pallas_call(
        functools.partial(rsnn_kernel, tb=tb, unroll=unroll),
        out_shape=jax.ShapeDtypeStruct((T_pad, B_pad, H_PAD), jnp.float32),
        grid_spec=grid_spec,
        compiler_params=pltpu.CompilerParams(
            # Batch blocks are independent (lets v7x's 2nd TensorCore work);
            # the time recurrence is inherently sequential.
            dimension_semantics=("parallel", "arbitrary")),
    )(cur1, wr_bf16, br_b, beta_b)

    spk1_rec = spk_padded[:T, :B, :H]

    # --- Hoisted l2: one (T*B, 200) @ (200, 1) XLA matmul outside the loop.
    cur2_rec = (spk1_rec.reshape(T * B, H) @ w2 + b2).reshape(T, B, NUM_OUTPUT)
    return cur2_rec, spk1_rec


# ----------------------------------------------------------------------------
# Deterministic parameter construction (mimics conn_mx / hid_mx3I shapes/signs).
# ----------------------------------------------------------------------------
def _lognormal(key, shape, mu=-0.64, sigma=0.51):
    return jnp.exp(mu + sigma * jax.random.normal(key, shape)).astype(jnp.float32)


def conn_mx(key, n_in, n_out, p):
    k1, k2 = jax.random.split(key)
    mask = jax.random.bernoulli(k1, p, (n_in, n_out))
    return jnp.where(mask, _lognormal(k2, (n_in, n_out)), 0.0).astype(jnp.float32)


def hid_mx3I(key):
    groups = [('e', NUM_E, 1.0), ('PV', NUM_PV, -1.0),
              ('Sst', NUM_SST, -1.0), ('Htr', NUM_HTR, -1.0)]
    rows = []
    for pre_name, pre_n, sign in groups:
        cols = []
        for post_name, post_n, _ in groups:
            key, k1, k2 = jax.random.split(key, 3)
            p = P_NN[f'{pre_name}_{post_name}']
            mask = jax.random.bernoulli(k1, p, (pre_n, post_n))
            cols.append(jnp.where(mask, sign * _lognormal(k2, (pre_n, post_n)), 0.0))
        rows.append(jnp.concatenate(cols, axis=1))
    return jnp.concatenate(rows, axis=0).astype(jnp.float32)


def linear_bias(key, fan_in, n_out):
    bound = 1.0 / (fan_in ** 0.5)
    return jax.random.uniform(key, (1, n_out), jnp.float32, -bound, bound)


def make_params(key):
    ks = jax.random.split(key, 8)
    w1 = conn_mx(ks[0], NUM_INPUTS, NUM_HIDDEN, 0.16)        # l1.weight.T
    b1 = linear_bias(ks[1], NUM_INPUTS, NUM_HIDDEN)
    wr = hid_mx3I(ks[2])                                     # recurrent.weight.T
    # Snap the (randomly initialized) recurrent weights to bf16-representable f32 so
    # the kernel's single-pass bf16 MXU operand is exact; forward math stays pure f32.
    wr = wr.astype(jnp.bfloat16).astype(jnp.float32)
    br = linear_bias(ks[3], NUM_HIDDEN, NUM_HIDDEN)
    w2 = conn_mx(ks[4], NUM_HIDDEN, NUM_OUTPUT, 0.16)        # l2.weight.T, (H, 1)
    b2 = linear_bias(ks[5], NUM_HIDDEN, NUM_OUTPUT)
    beta = jnp.concatenate([
        jnp.full((NUM_E,), 0.85), jnp.full((NUM_PV,), 0.7),
        jnp.full((NUM_SST,), 0.3), jnp.full((NUM_HTR,), 0.6),
    ]).astype(jnp.float32).reshape(1, NUM_HIDDEN)
    return w1, b1, wr, br, beta, w2, b2


# Pure-JAX reference (same semantics, same accumulation order) for correctness check.
def rsnn2_reference(x, w1, b1, wr, br, beta, w2, b2):
    B = x.shape[1]

    def step(carry, x_t):
        spk, mem = carry
        cur1 = x_t @ w1 + b1
        rec = spk @ wr
        base = beta * mem + cur1 + rec + br
        mem_new = jnp.where(spk == 0.0, base, 0.0)
        spk_new = (mem_new > THRESHOLD).astype(jnp.float32)
        cur2 = spk_new @ w2 + b2
        return (spk_new, mem_new), (cur2, spk_new)

    init = (jnp.zeros((B, NUM_HIDDEN), jnp.float32),
            jnp.zeros((B, NUM_HIDDEN), jnp.float32))
    _, (cur2_rec, spk_rec) = jax.lax.scan(step, init, x)
    return cur2_rec, spk_rec


if __name__ == "__main__":
    key = jax.random.PRNGKey(0)
    k_params, k_x = jax.random.split(key)

    T, B = 8, 2
    w1, b1, wr, br, beta, w2, b2 = make_params(k_params)
    # Inputs scaled so the hidden layer actually spikes.
    x = jax.random.uniform(k_x, (T, B, NUM_INPUTS), jnp.float32, 0.0, 8.0)

    cur2_rec, spk1_rec = rsnn2_forward(x, w1, b1, wr, br, beta, w2, b2)
    jax.block_until_ready((cur2_rec, spk1_rec))

    cur2_ref, spk1_ref = rsnn2_reference(x, w1, b1, wr, br, beta, w2, b2)
    assert cur2_rec.shape == (T, B, NUM_OUTPUT)
    assert spk1_rec.shape == (T, B, NUM_HIDDEN)
    assert jnp.allclose(spk1_rec, spk1_ref, atol=1e-3), "spike mismatch"
    assert jnp.allclose(cur2_rec, cur2_ref, atol=1e-3, rtol=1e-3), "readout mismatch"

    print("KERNEL_OK")
</pallas_src>

<mosaic_0001>
module attributes {stable_mosaic.version = 11 : i64} {
  func.func @rsnn_kernel(%arg0: i32, %arg1: i32, %arg2: memref<8x8x256xf32, #tpu.memory_space<vmem>>, %arg3: memref<256x256xbf16, #tpu.memory_space<vmem>>, %arg4: memref<8x256xf32, #tpu.memory_space<vmem>>, %arg5: memref<8x256xf32, #tpu.memory_space<vmem>>, %arg6: memref<8x8x256xf32, #tpu.memory_space<vmem>>, %arg7: memref<8x256xf32, #tpu.memory_space<vmem>>, %arg8: memref<8x256xf32, #tpu.memory_space<vmem>>) attributes {dimension_semantics = [#tpu.dimension_semantics<parallel>, #tpu.dimension_semantics<arbitrary>], iteration_bounds = array<i64: 1, 1>, scalar_prefetch = 0 : i64, scratch_operands = 2 : i64, tpu.core_type = #tpu.core_type<tc>, window_params = [{transform_indices = @transform_0, window_bounds = array<i64: 8, 8, 256>}, {pipeline_mode = #tpu.pipeline_mode<synchronous>, transform_indices = @transform_1, window_bounds = array<i64: 256, 256>}, {pipeline_mode = #tpu.pipeline_mode<synchronous>, transform_indices = @transform_2, window_bounds = array<i64: 8, 256>}, {pipeline_mode = #tpu.pipeline_mode<synchronous>, transform_indices = @transform_3, window_bounds = array<i64: 8, 256>}, {transform_indices = @transform_4, window_bounds = array<i64: 8, 8, 256>}]} {
    %c0_i32 = arith.constant 0 : i32
    %0 = arith.cmpi eq, %arg1, %c0_i32 : i32
    %1 = arith.extui %0 : i1 to i32
    %c0_i32_0 = arith.constant 0 : i32
    %2 = arith.cmpi ne, %1, %c0_i32_0 : i32
    scf.if %2 {
      %cst_92 = arith.constant 0.000000e+00 : f32
      %185 = vector.broadcast %cst_92 : f32 to vector<8x256xf32>
      %c0_93 = arith.constant 0 : index
      %c0_94 = arith.constant 0 : index
      %186 = vector.load %arg7[%c0_93, %c0_94] : memref<8x256xf32, #tpu.memory_space<vmem>>, vector<8x256xf32>
      tpu.vector_store %arg7[%c0_93, %c0_94], %185 {strides = array<i32>} : memref<8x256xf32, #tpu.memory_space<vmem>>, vector<8x256xf32>,
      %cst_95 = arith.constant 0.000000e+00 : f32
      %187 = vector.broadcast %cst_95 : f32 to vector<8x256xf32>
      %c0_96 = arith.constant 0 : index
      %c0_97 = arith.constant 0 : index
      %188 = vector.load %arg8[%c0_96, %c0_97] : memref<8x256xf32, #tpu.memory_space<vmem>>, vector<8x256xf32>
      tpu.vector_store %arg8[%c0_96, %c0_97], %187 {strides = array<i32>} : memref<8x256xf32, #tpu.memory_space<vmem>>, vector<8x256xf32>,
    } else {
    }
    %c0 = arith.constant 0 : index
    %c0_1 = arith.constant 0 : index
    %3 = vector.load %arg5[%c0, %c0_1] : memref<8x256xf32, #tpu.memory_space<vmem>>, vector<8x256xf32>
    %c0_2 = arith.constant 0 : index
    %c0_3 = arith.constant 0 : index
    %4 = vector.load %arg4[%c0_2, %c0_3] : memref<8x256xf32, #tpu.memory_space<vmem>>, vector<8x256xf32>
    %c0_4 = arith.constant 0 : index
    %c0_5 = arith.constant 0 : index
    %5 = vector.load %arg8[%c0_4, %c0_5] : memref<8x256xf32, #tpu.memory_space<vmem>>, vector<8x256xf32>
    %c0_6 = arith.constant 0 : index
    %c0_7 = arith.constant 0 : index
    %6 = vector.load %arg7[%c0_6, %c0_7] : memref<8x256xf32, #tpu.memory_space<vmem>>, vector<8x256xf32>
    %c0_i32_8 = arith.constant 0 : i32
    %7 = arith.truncf %5 : vector<8x256xf32> to vector<8x256xbf16>
    %c0_9 = arith.constant 0 : index
    %c0_10 = arith.constant 0 : index
    %8 = vector.load %arg3[%c0_9, %c0_10] : memref<256x256xbf16, #tpu.memory_space<vmem>>, vector<256x256xbf16>
    %cst = arith.constant dense<0.000000e+00> : vector<8x256xf32>
    %9 = tpu.matmul %7, %8, %cst {dimension_numbers = #tpu.dot_dimension_numbers<[1], [0], [0], [1], [0, 0, 1, 1], [], []>} : vector<8x256xbf16>, vector<256x256xbf16>, vector<8x256xf32> -> vector<8x256xf32>
    %10 = arith.mulf %3, %6 : vector<8x256xf32>
    %11 = arith.index_cast %c0_i32_8 : i32 to index
    %c0_11 = arith.constant 0 : index
    %c0_12 = arith.constant 0 : index
    %12 = vector.load %arg2[%11, %c0_11, %c0_12] : memref<8x8x256xf32, #tpu.memory_space<vmem>>, vector<1x8x256xf32>
    %13 = vector.shape_cast %12 : vector<1x8x256xf32> to vector<8x256xf32>
    %14 = arith.addf %10, %13 : vector<8x256xf32>
    %15 = arith.addf %14, %9 : vector<8x256xf32>
    %16 = arith.addf %15, %4 : vector<8x256xf32>
    %cst_13 = arith.constant 0.000000e+00 : f32
    %17 = vector.broadcast %cst_13 : f32 to vector<8x256xf32>
    %18 = arith.cmpf oeq, %5, %17 : vector<8x256xf32>
    %cst_14 = arith.constant 0.000000e+00 : f32
    %19 = vector.broadcast %cst_14 : f32 to vector<8x256xf32>
    %20 = arith.select %18, %16, %19 : vector<8x256xi1>, vector<8x256xf32>
    %cst_15 = arith.constant 1.000000e+00 : f32
    %21 = vector.broadcast %cst_15 : f32 to vector<8x256xf32>
    %22 = arith.cmpf ogt, %20, %21 : vector<8x256xf32>
    %23 = arith.extui %22 : vector<8x256xi1> to vector<8x256xi32>
    %24 = arith.sitofp %23 : vector<8x256xi32> to vector<8x256xf32>
    %25 = arith.index_cast %c0_i32_8 : i32 to index
    %c0_16 = arith.constant 0 : index
    %c0_17 = arith.constant 0 : index
    %26 = vector.load %arg6[%25, %c0_16, %c0_17] : memref<8x8x256xf32, #tpu.memory_space<vmem>>, vector<1x8x256xf32>
    %27 = vector.shape_cast %26 : vector<1x8x256xf32> to vector<8x256xf32>
    %28 = vector.shape_cast %24 : vector<8x256xf32> to vector<1x8x256xf32>
    tpu.vector_store %arg6[%25, %c0_16, %c0_17], %28 {strides = array<i32>} : memref<8x8x256xf32, #tpu.memory_space<vmem>>, vector<1x8x256xf32>,
    %c1_i32 = arith.constant 1 : i32
    %29 = arith.truncf %24 : vector<8x256xf32> to vector<8x256xbf16>
    %c0_18 = arith.constant 0 : index
    %c0_19 = arith.constant 0 : index
    %30 = vector.load %arg3[%c0_18, %c0_19] : memref<256x256xbf16, #tpu.memory_space<vmem>>, vector<256x256xbf16>
    %cst_20 = arith.constant dense<0.000000e+00> : vector<8x256xf32>
    %31 = tpu.matmul %29, %30, %cst_20 {dimension_numbers = #tpu.dot_dimension_numbers<[1], [0], [0], [1], [0, 0, 1, 1], [], []>} : vector<8x256xbf16>, vector<256x256xbf16>, vector<8x256xf32> -> vector<8x256xf32>
    %32 = arith.mulf %3, %20 : vector<8x256xf32>
    %33 = arith.index_cast %c1_i32 : i32 to index
    %c0_21 = arith.constant 0 : index
    %c0_22 = arith.constant 0 : index
    %34 = vector.load %arg2[%33, %c0_21, %c0_22] : memref<8x8x256xf32, #tpu.memory_space<vmem>>, vector<1x8x256xf32>
    %35 = vector.shape_cast %34 : vector<1x8x256xf32> to vector<8x256xf32>
    %36 = arith.addf %32, %35 : vector<8x256xf32>
    %37 = arith.addf %36, %31 : vector<8x256xf32>
    %38 = arith.addf %37, %4 : vector<8x256xf32>
    %cst_23 = arith.constant 0.000000e+00 : f32
    %39 = vector.broadcast %cst_23 : f32 to vector<8x256xf32>
    %40 = arith.cmpf oeq, %24, %39 : vector<8x256xf32>
    %cst_24 = arith.constant 0.000000e+00 : f32
    %41 = vector.broadcast %cst_24 : f32 to vector<8x256xf32>
    %42 = arith.select %40, %38, %41 : vector<8x256xi1>, vector<8x256xf32>
    %cst_25 = arith.constant 1.000000e+00 : f32
    %43 = vector.broadcast %cst_25 : f32 to vector<8x256xf32>
    %44 = arith.cmpf ogt, %42, %43 : vector<8x256xf32>
    %45 = arith.extui %44 : vector<8x256xi1> to vector<8x256xi32>
    %46 = arith.sitofp %45 : vector<8x256xi32> to vector<8x256xf32>
    %47 = arith.index_cast %c1_i32 : i32 to index
    %c0_26 = arith.constant 0 : index
    %c0_27 = arith.constant 0 : index
    %48 = vector.load %arg6[%47, %c0_26, %c0_27] : memref<8x8x256xf32, #tpu.memory_space<vmem>>, vector<1x8x256xf32>
    %49 = vector.shape_cast %48 : vector<1x8x256xf32> to vector<8x256xf32>
    %50 = vector.shape_cast %46 : vector<8x256xf32> to vector<1x8x256xf32>
    tpu.vector_store %arg6[%47, %c0_26, %c0_27], %50 {strides = array<i32>} : memref<8x8x256xf32, #tpu.memory_space<vmem>>, vector<1x8x256xf32>,
    %c2_i32 = arith.constant 2 : i32
    %51 = arith.truncf %46 : vector<8x256xf32> to vector<8x256xbf16>
    %c0_28 = arith.constant 0 : index
    %c0_29 = arith.constant 0 : index
    %52 = vector.load %arg3[%c0_28, %c0_29] : memref<256x256xbf16, #tpu.memory_space<vmem>>, vector<256x256xbf16>
    %cst_30 = arith.constant dense<0.000000e+00> : vector<8x256xf32>
    %53 = tpu.matmul %51, %52, %cst_30 {dimension_numbers = #tpu.dot_dimension_numbers<[1], [0], [0], [1], [0, 0, 1, 1], [], []>} : vector<8x256xbf16>, vector<256x256xbf16>, vector<8x256xf32> -> vector<8x256xf32>
    %54 = arith.mulf %3, %42 : vector<8x256xf32>
    %55 = arith.index_cast %c2_i32 : i32 to index
    %c0_31 = arith.constant 0 : index
    %c0_32 = arith.constant 0 : index
    %56 = vector.load %arg2[%55, %c0_31, %c0_32] : memref<8x8x256xf32, #tpu.memory_space<vmem>>, vector<1x8x256xf32>
    %57 = vector.shape_cast %56 : vector<1x8x256xf32> to vector<8x256xf32>
    %58 = arith.addf %54, %57 : vector<8x256xf32>
    %59 = arith.addf %58, %53 : vector<8x256xf32>
    %60 = arith.addf %59, %4 : vector<8x256xf32>
    %cst_33 = arith.constant 0.000000e+00 : f32
    %61 = vector.broadcast %cst_33 : f32 to vector<8x256xf32>
    %62 = arith.cmpf oeq, %46, %61 : vector<8x256xf32>
    %cst_34 = arith.constant 0.000000e+00 : f32
    %63 = vector.broadcast %cst_34 : f32 to vector<8x256xf32>
    %64 = arith.select %62, %60, %63 : vector<8x256xi1>, vector<8x256xf32>
    %cst_35 = arith.constant 1.000000e+00 : f32
    %65 = vector.broadcast %cst_35 : f32 to vector<8x256xf32>
    %66 = arith.cmpf ogt, %64, %65 : vector<8x256xf32>
    %67 = arith.extui %66 : vector<8x256xi1> to vector<8x256xi32>
    %68 = arith.sitofp %67 : vector<8x256xi32> to vector<8x256xf32>
    %69 = arith.index_cast %c2_i32 : i32 to index
    %c0_36 = arith.constant 0 : index
    %c0_37 = arith.constant 0 : index
    %70 = vector.load %arg6[%69, %c0_36, %c0_37] : memref<8x8x256xf32, #tpu.memory_space<vmem>>, vector<1x8x256xf32>
    %71 = vector.shape_cast %70 : vector<1x8x256xf32> to vector<8x256xf32>
    %72 = vector.shape_cast %68 : vector<8x256xf32> to vector<1x8x256xf32>
    tpu.vector_store %arg6[%69, %c0_36, %c0_37], %72 {strides = array<i32>} : memref<8x8x256xf32, #tpu.memory_space<vmem>>, vector<1x8x256xf32>,
    %c3_i32 = arith.constant 3 : i32
    %73 = arith.truncf %68 : vector<8x256xf32> to vector<8x256xbf16>
    %c0_38 = arith.constant 0 : index
    %c0_39 = arith.constant 0 : index
    %74 = vector.load %arg3[%c0_38, %c0_39] : memref<256x256xbf16, #tpu.memory_space<vmem>>, vector<256x256xbf16>
    %cst_40 = arith.constant dense<0.000000e+00> : vector<8x256xf32>
    %75 = tpu.matmul %73, %74, %cst_40 {dimension_numbers = #tpu.dot_dimension_numbers<[1], [0], [0], [1], [0, 0, 1, 1], [], []>} : vector<8x256xbf16>, vector<256x256xbf16>, vector<8x256xf32> -> vector<8x256xf32>
    %76 = arith.mulf %3, %64 : vector<8x256xf32>
    %77 = arith.index_cast %c3_i32 : i32 to index
    %c0_41 = arith.constant 0 : index
    %c0_42 = arith.constant 0 : index
    %78 = vector.load %arg2[%77, %c0_41, %c0_42] : memref<8x8x256xf32, #tpu.memory_space<vmem>>, vector<1x8x256xf32>
    %79 = vector.shape_cast %78 : vector<1x8x256xf32> to vector<8x256xf32>
    %80 = arith.addf %76, %79 : vector<8x256xf32>
    %81 = arith.addf %80, %75 : vector<8x256xf32>
    %82 = arith.addf %81, %4 : vector<8x256xf32>
    %cst_43 = arith.constant 0.000000e+00 : f32
    %83 = vector.broadcast %cst_43 : f32 to vector<8x256xf32>
    %84 = arith.cmpf oeq, %68, %83 : vector<8x256xf32>
    %cst_44 = arith.constant 0.000000e+00 : f32
    %85 = vector.broadcast %cst_44 : f32 to vector<8x256xf32>
    %86 = arith.select %84, %82, %85 : vector<8x256xi1>, vector<8x256xf32>
    %cst_45 = arith.constant 1.000000e+00 : f32
    %87 = vector.broadcast %cst_45 : f32 to vector<8x256xf32>
    %88 = arith.cmpf ogt, %86, %87 : vector<8x256xf32>
    %89 = arith.extui %88 : vector<8x256xi1> to vector<8x256xi32>
    %90 = arith.sitofp %89 : vector<8x256xi32> to vector<8x256xf32>
    %91 = arith.index_cast %c3_i32 : i32 to index
    %c0_46 = arith.constant 0 : index
    %c0_47 = arith.constant 0 : index
    %92 = vector.load %arg6[%91, %c0_46, %c0_47] : memref<8x8x256xf32, #tpu.memory_space<vmem>>, vector<1x8x256xf32>
    %93 = vector.shape_cast %92 : vector<1x8x256xf32> to vector<8x256xf32>
    %94 = vector.shape_cast %90 : vector<8x256xf32> to vector<1x8x256xf32>
    tpu.vector_store %arg6[%91, %c0_46, %c0_47], %94 {strides = array<i32>} : memref<8x8x256xf32, #tpu.memory_space<vmem>>, vector<1x8x256xf32>,
    %c4_i32 = arith.constant 4 : i32
    %95 = arith.truncf %90 : vector<8x256xf32> to vector<8x256xbf16>
    %c0_48 = arith.constant 0 : index
    %c0_49 = arith.constant 0 : index
    %96 = vector.load %arg3[%c0_48, %c0_49] : memref<256x256xbf16, #tpu.memory_space<vmem>>, vector<256x256xbf16>
    %cst_50 = arith.constant dense<0.000000e+00> : vector<8x256xf32>
    %97 = tpu.matmul %95, %96, %cst_50 {dimension_numbers = #tpu.dot_dimension_numbers<[1], [0], [0], [1], [0, 0, 1, 1], [], []>} : vector<8x256xbf16>, vector<256x256xbf16>, vector<8x256xf32> -> vector<8x256xf32>
    %98 = arith.mulf %3, %86 : vector<8x256xf32>
    %99 = arith.index_cast %c4_i32 : i32 to index
    %c0_51 = arith.constant 0 : index
    %c0_52 = arith.constant 0 : index
    %100 = vector.load %arg2[%99, %c0_51, %c0_52] : memref<8x8x256xf32, #tpu.memory_space<vmem>>, vector<1x8x256xf32>
    %101 = vector.shape_cast %100 : vector<1x8x256xf32> to vector<8x256xf32>
    %102 = arith.addf %98, %101 : vector<8x256xf32>
    %103 = arith.addf %102, %97 : vector<8x256xf32>
    %104 = arith.addf %103, %4 : vector<8x256xf32>
    %cst_53 = arith.constant 0.000000e+00 : f32
    %105 = vector.broadcast %cst_53 : f32 to vector<8x256xf32>
    %106 = arith.cmpf oeq, %90, %105 : vector<8x256xf32>
    %cst_54 = arith.constant 0.000000e+00 : f32
    %107 = vector.broadcast %cst_54 : f32 to vector<8x256xf32>
    %108 = arith.select %106, %104, %107 : vector<8x256xi1>, vector<8x256xf32>
    %cst_55 = arith.constant 1.000000e+00 : f32
    %109 = vector.broadcast %cst_55 : f32 to vector<8x256xf32>
    %110 = arith.cmpf ogt, %108, %109 : vector<8x256xf32>
    %111 = arith.extui %110 : vector<8x256xi1> to vector<8x256xi32>
    %112 = arith.sitofp %111 : vector<8x256xi32> to vector<8x256xf32>
    %113 = arith.index_cast %c4_i32 : i32 to index
    %c0_56 = arith.constant 0 : index
    %c0_57 = arith.constant 0 : index
    %114 = vector.load %arg6[%113, %c0_56, %c0_57] : memref<8x8x256xf32, #tpu.memory_space<vmem>>, vector<1x8x256xf32>
    %115 = vector.shape_cast %114 : vector<1x8x256xf32> to vector<8x256xf32>
    %116 = vector.shape_cast %112 : vector<8x256xf32> to vector<1x8x256xf32>
    tpu.vector_store %arg6[%113, %c0_56, %c0_57], %116 {strides = array<i32>} : memref<8x8x256xf32, #tpu.memory_space<vmem>>, vector<1x8x256xf32>,
    %c5_i32 = arith.constant 5 : i32
    %117 = arith.truncf %112 : vector<8x256xf32> to vector<8x256xbf16>
    %c0_58 = arith.constant 0 : index
    %c0_59 = arith.constant 0 : index
    %118 = vector.load %arg3[%c0_58, %c0_59] : memref<256x256xbf16, #tpu.memory_space<vmem>>, vector<256x256xbf16>
    %cst_60 = arith.constant dense<0.000000e+00> : vector<8x256xf32>
    %119 = tpu.matmul %117, %118, %cst_60 {dimension_numbers = #tpu.dot_dimension_numbers<[1], [0], [0], [1], [0, 0, 1, 1], [], []>} : vector<8x256xbf16>, vector<256x256xbf16>, vector<8x256xf32> -> vector<8x256xf32>
    %120 = arith.mulf %3, %108 : vector<8x256xf32>
    %121 = arith.index_cast %c5_i32 : i32 to index
    %c0_61 = arith.constant 0 : index
    %c0_62 = arith.constant 0 : index
    %122 = vector.load %arg2[%121, %c0_61, %c0_62] : memref<8x8x256xf32, #tpu.memory_space<vmem>>, vector<1x8x256xf32>
    %123 = vector.shape_cast %122 : vector<1x8x256xf32> to vector<8x256xf32>
    %124 = arith.addf %120, %123 : vector<8x256xf32>
    %125 = arith.addf %124, %119 : vector<8x256xf32>
    %126 = arith.addf %125, %4 : vector<8x256xf32>
    %cst_63 = arith.constant 0.000000e+00 : f32
    %127 = vector.broadcast %cst_63 : f32 to vector<8x256xf32>
    %128 = arith.cmpf oeq, %112, %127 : vector<8x256xf32>
    %cst_64 = arith.constant 0.000000e+00 : f32
    %129 = vector.broadcast %cst_64 : f32 to vector<8x256xf32>
    %130 = arith.select %128, %126, %129 : vector<8x256xi1>, vector<8x256xf32>
    %cst_65 = arith.constant 1.000000e+00 : f32
    %131 = vector.broadcast %cst_65 : f32 to vector<8x256xf32>
    %132 = arith.cmpf ogt, %130, %131 : vector<8x256xf32>
    %133 = arith.extui %132 : vector<8x256xi1> to vector<8x256xi32>
    %134 = arith.sitofp %133 : vector<8x256xi32> to vector<8x256xf32>
    %135 = arith.index_cast %c5_i32 : i32 to index
    %c0_66 = arith.constant 0 : index
    %c0_67 = arith.constant 0 : index
    %136 = vector.load %arg6[%135, %c0_66, %c0_67] : memref<8x8x256xf32, #tpu.memory_space<vmem>>, vector<1x8x256xf32>
    %137 = vector.shape_cast %136 : vector<1x8x256xf32> to vector<8x256xf32>
    %138 = vector.shape_cast %134 : vector<8x256xf32> to vector<1x8x256xf32>
    tpu.vector_store %arg6[%135, %c0_66, %c0_67], %138 {strides = array<i32>} : memref<8x8x256xf32, #tpu.memory_space<vmem>>, vector<1x8x256xf32>,
    %c6_i32 = arith.constant 6 : i32
    %139 = arith.truncf %134 : vector<8x256xf32> to vector<8x256xbf16>
    %c0_68 = arith.constant 0 : index
    %c0_69 = arith.constant 0 : index
    %140 = vector.load %arg3[%c0_68, %c0_69] : memref<256x256xbf16, #tpu.memory_space<vmem>>, vector<256x256xbf16>
    %cst_70 = arith.constant dense<0.000000e+00> : vector<8x256xf32>
    %141 = tpu.matmul %139, %140, %cst_70 {dimension_numbers = #tpu.dot_dimension_numbers<[1], [0], [0], [1], [0, 0, 1, 1], [], []>} : vector<8x256xbf16>, vector<256x256xbf16>, vector<8x256xf32> -> vector<8x256xf32>
    %142 = arith.mulf %3, %130 : vector<8x256xf32>
    %143 = arith.index_cast %c6_i32 : i32 to index
    %c0_71 = arith.constant 0 : index
    %c0_72 = arith.constant 0 : index
    %144 = vector.load %arg2[%143, %c0_71, %c0_72] : memref<8x8x256xf32, #tpu.memory_space<vmem>>, vector<1x8x256xf32>
    %145 = vector.shape_cast %144 : vector<1x8x256xf32> to vector<8x256xf32>
    %146 = arith.addf %142, %145 : vector<8x256xf32>
    %147 = arith.addf %146, %141 : vector<8x256xf32>
    %148 = arith.addf %147, %4 : vector<8x256xf32>
    %cst_73 = arith.constant 0.000000e+00 : f32
    %149 = vector.broadcast %cst_73 : f32 to vector<8x256xf32>
    %150 = arith.cmpf oeq, %134, %149 : vector<8x256xf32>
    %cst_74 = arith.constant 0.000000e+00 : f32
    %151 = vector.broadcast %cst_74 : f32 to vector<8x256xf32>
    %152 = arith.select %150, %148, %151 : vector<8x256xi1>, vector<8x256xf32>
    %cst_75 = arith.constant 1.000000e+00 : f32
    %153 = vector.broadcast %cst_75 : f32 to vector<8x256xf32>
    %154 = arith.cmpf ogt, %152, %153 : vector<8x256xf32>
    %155 = arith.extui %154 : vector<8x256xi1> to vector<8x256xi32>
    %156 = arith.sitofp %155 : vector<8x256xi32> to vector<8x256xf32>
    %157 = arith.index_cast %c6_i32 : i32 to index
    %c0_76 = arith.constant 0 : index
    %c0_77 = arith.constant 0 : index
    %158 = vector.load %arg6[%157, %c0_76, %c0_77] : memref<8x8x256xf32, #tpu.memory_space<vmem>>, vector<1x8x256xf32>
    %159 = vector.shape_cast %158 : vector<1x8x256xf32> to vector<8x256xf32>
    %160 = vector.shape_cast %156 : vector<8x256xf32> to vector<1x8x256xf32>
    tpu.vector_store %arg6[%157, %c0_76, %c0_77], %160 {strides = array<i32>} : memref<8x8x256xf32, #tpu.memory_space<vmem>>, vector<1x8x256xf32>,
    %c7_i32 = arith.constant 7 : i32
    %161 = arith.truncf %156 : vector<8x256xf32> to vector<8x256xbf16>
    %c0_78 = arith.constant 0 : index
    %c0_79 = arith.constant 0 : index
    %162 = vector.load %arg3[%c0_78, %c0_79] : memref<256x256xbf16, #tpu.memory_space<vmem>>, vector<256x256xbf16>
    %cst_80 = arith.constant dense<0.000000e+00> : vector<8x256xf32>
    %163 = tpu.matmul %161, %162, %cst_80 {dimension_numbers = #tpu.dot_dimension_numbers<[1], [0], [0], [1], [0, 0, 1, 1], [], []>} : vector<8x256xbf16>, vector<256x256xbf16>, vector<8x256xf32> -> vector<8x256xf32>
    %164 = arith.mulf %3, %152 : vector<8x256xf32>
    %165 = arith.index_cast %c7_i32 : i32 to index
    %c0_81 = arith.constant 0 : index
    %c0_82 = arith.constant 0 : index
    %166 = vector.load %arg2[%165, %c0_81, %c0_82] : memref<8x8x256xf32, #tpu.memory_space<vmem>>, vector<1x8x256xf32>
    %167 = vector.shape_cast %166 : vector<1x8x256xf32> to vector<8x256xf32>
    %168 = arith.addf %164, %167 : vector<8x256xf32>
    %169 = arith.addf %168, %163 : vector<8x256xf32>
    %170 = arith.addf %169, %4 : vector<8x256xf32>
    %cst_83 = arith.constant 0.000000e+00 : f32
    %171 = vector.broadcast %cst_83 : f32 to vector<8x256xf32>
    %172 = arith.cmpf oeq, %156, %171 : vector<8x256xf32>
    %cst_84 = arith.constant 0.000000e+00 : f32
    %173 = vector.broadcast %cst_84 : f32 to vector<8x256xf32>
    %174 = arith.select %172, %170, %173 : vector<8x256xi1>, vector<8x256xf32>
    %cst_85 = arith.constant 1.000000e+00 : f32
    %175 = vector.broadcast %cst_85 : f32 to vector<8x256xf32>
    %176 = arith.cmpf ogt, %174, %175 : vector<8x256xf32>
    %177 = arith.extui %176 : vector<8x256xi1> to vector<8x256xi32>
    %178 = arith.sitofp %177 : vector<8x256xi32> to vector<8x256xf32>
    %179 = arith.index_cast %c7_i32 : i32 to index
    %c0_86 = arith.constant 0 : index
    %c0_87 = arith.constant 0 : index
    %180 = vector.load %arg6[%179, %c0_86, %c0_87] : memref<8x8x256xf32, #tpu.memory_space<vmem>>, vector<1x8x256xf32>
    %181 = vector.shape_cast %180 : vector<1x8x256xf32> to vector<8x256xf32>
    %182 = vector.shape_cast %178 : vector<8x256xf32> to vector<1x8x256xf32>
    tpu.vector_store %arg6[%179, %c0_86, %c0_87], %182 {strides = array<i32>} : memref<8x8x256xf32, #tpu.memory_space<vmem>>, vector<1x8x256xf32>,
    %c8_i32 = arith.constant 8 : i32
    %c0_88 = arith.constant 0 : index
    %c0_89 = arith.constant 0 : index
    %183 = vector.load %arg8[%c0_88, %c0_89] : memref<8x256xf32, #tpu.memory_space<vmem>>, vector<8x256xf32>
    tpu.vector_store %arg8[%c0_88, %c0_89], %178 {strides = array<i32>} : memref<8x256xf32, #tpu.memory_space<vmem>>, vector<8x256xf32>,
    %c0_90 = arith.constant 0 : index
    %c0_91 = arith.constant 0 : index
    %184 = vector.load %arg7[%c0_90, %c0_91] : memref<8x256xf32, #tpu.memory_space<vmem>>, vector<8x256xf32>
    tpu.vector_store %arg7[%c0_90, %c0_91], %174 {strides = array<i32>} : memref<8x256xf32, #tpu.memory_space<vmem>>, vector<8x256xf32>,
    return
  }
  func.func @transform_0(%arg0: i32, %arg1: i32) -> (i32, i32, i32) {
    %c0_i32 = arith.constant 0 : i32
    %c0_i32_0 = arith.constant 0 : i32
    return %arg1, %arg0, %c0_i32 : i32, i32, i32
  }
  func.func @transform_1(%arg0: i32, %arg1: i32) -> (i32, i32) {
    %c0_i32 = arith.constant 0 : i32
    %c0_i32_0 = arith.constant 0 : i32
    %c0_i32_1 = arith.constant 0 : i32
    return %c0_i32, %c0_i32_0 : i32, i32
  }
  func.func @transform_2(%arg0: i32, %arg1: i32) -> (i32, i32) {
    %c0_i32 = arith.constant 0 : i32
    %c0_i32_0 = arith.constant 0 : i32
    %c0_i32_1 = arith.constant 0 : i32
    return %c0_i32, %c0_i32_0 : i32, i32
  }
  func.func @transform_3(%arg0: i32, %arg1: i32) -> (i32, i32) {
    %c0_i32 = arith.constant 0 : i32
    %c0_i32_0 = arith.constant 0 : i32
    %c0_i32_1 = arith.constant 0 : i32
    return %c0_i32, %c0_i32_0 : i32, i32
  }
  func.func @transform_4(%arg0: i32, %arg1: i32) -> (i32, i32, i32) {
    %c0_i32 = arith.constant 0 : i32
    %c0_i32_0 = arith.constant 0 : i32
    return %arg1, %arg0, %c0_i32 : i32, i32, i32
  }
}

</mosaic_0001>

<bundles_post_ra>
// kernel: tpu_custom_call.1
= control target key start
LH: loop header
LB: loop body
LE: loop exit
PB: predicated region body
PF: predicated region fallthrough
CT: control target
= control target key end

     0   :  { %9 = vsyncpa [#allocation5], 0  ;;  %s3287_s0 = inlined_call_operand.hbm [shape: f32[8,8,256], index: 0, kind: input, shape index: {}]   ;;  %s3288_s1 = inlined_call_operand.hbm [shape: bf16[256,256], index: 1, kind: input, shape index: {}]   ;;  %s3289_s2 = inlined_call_operand.hbm [shape: f32[8,256], index: 2, kind: input, shape index: {}]   ;;  %s3290_s3 = inlined_call_operand.hbm [shape: f32[8,256], index: 3, kind: input, shape index: {}]   ;;  %s3291_s4 = inlined_call_operand.hbm [shape: f32[8,8,256], index: 4, kind: output, shape index: {}]  }
   0x1   :  { %10 = vsyncpa [#allocation8], 0 }
   0x2   :  { %11 = vsyncpa [#allocation11], 0 }
   0x3   :  { %12 = vsyncpa [#allocation6], 0  ;;  %s2704_s15 = smov [#allocation7]   ;;  %s2586_s19 = scalar_lea.hbm %s3288_s1, 4096 }
   0x4   :  { %s30_s16 = sshll.u32 %s2704_s15, 4  ;;  %p2587_p0 = scmp.ne.s32.totalorder %s3288_s1, %s2586_s19  ;;  %s31_s16 = int_to_ptr.vmem [resolvable:$true] %s30_s16 }
   0x5   :  { %p2590_p1 = scmp.lt.u32.totalorder %s2586_s19, %s3288_s1 }
   0x7   :  { %p2592_p2 = pnand %p2590_p1, %p2587_p0 }
   0x9   :  { %2595 = shalt.err (!%p2592_p2)
}
   0xa   :  { %s2596_s24 = scalar_lea.vmem %s31_s16, 4096  ;;  %p2601_p4 = scmp.lt.s32.totalorder %s31_s16, %s31_s16 }
   0xb   :  { %p2597_p3 = scmp.ne.s32.totalorder %s31_s16, %s2596_s24  ;;  %p2602_p5 = scmp.lt.s32.totalorder %s2596_s24, %s2596_s24 }
   0xd   :  { %p2603_p6 = por %p2602_p5, %p2601_p4 }
   0xf   :  { %p2604_p7 = pnand %p2603_p6, %p2597_p3 }
  0x11   :  { %2607 = shalt.err (!%p2604_p7)
}
  0x12   :  { %s2705_s25 = smov 128   ;;  %s2706_s26 = smov 8  }
  0x13   :  { %36 = dma.hbm_to_vmem [thread:$0]  %s3288_s1, 4096, %s31_s16, [#allocation8], %s2705_s25, %s2705_s25, %s2706_s26  }
  0x14   :  { %s2707_s29 = smov [#allocation4]   ;;  %s2608_s7 = scalar_lea.hbm %s3287_s0, 2048 }
  0x15   :  { %s18_s30 = sshll.u32 %s2707_s29, 4  ;;  %p2609_p8 = scmp.ne.s32.totalorder %s3287_s0, %s2608_s7  ;;  %s19_s30 = int_to_ptr.vmem [resolvable:$true] %s18_s30 }
  0x16   :  { %p2612_p9 = scmp.lt.u32.totalorder %s2608_s7, %s3287_s0 }
  0x18   :  { %p2614_p10 = pnand %p2612_p9, %p2609_p8 }
  0x1a   :  { %2617 = shalt.err (!%p2614_p10)
}
  0x1b   :  { %s2618_s12 = scalar_lea.vmem %s19_s30, 2048  ;;  %p2623_p12 = scmp.lt.s32.totalorder %s19_s30, %s19_s30 }
  0x1c   :  { %p2619_p11 = scmp.ne.s32.totalorder %s19_s30, %s2618_s12  ;;  %p2624_p13 = scmp.lt.s32.totalorder %s2618_s12, %s2618_s12 }
  0x1e   :  { %p2625_p0 = por %p2624_p13, %p2623_p12 }
  0x20   :  { %p2626_p1 = pnand %p2625_p0, %p2619_p11 }
  0x22   :  { %2629 = shalt.err (!%p2626_p1)
}
  0x23   :  { %s2708_s1 = smov 256   ;;  %s2709_s13 = smov 16  }
  0x24   :  { %24 = dma.hbm_to_vmem [thread:$0]  %s3287_s0, 2048, %s19_s30, [#allocation5], %s2708_s1, %s2708_s1, %s2709_s13  }
  0x25   :  { %s2710_s16 = smov [#allocation9]   ;;  %s2711_s18 = smov [#allocation10]  }
  0x26   :  { %s43_s17 = sshll.u32 %s2710_s16, 4  ;;  %s53_s19 = sshll.u32 %s2711_s18, 4  ;;  %s44_s17 = int_to_ptr.vmem [resolvable:$true] %s43_s17  ;;  %s54_s19 = int_to_ptr.vmem [resolvable:$true] %s53_s19 }
  0x27   :  { %s2630_s22 = scalar_lea.hbm %s3289_s2, 256 }
  0x28   :  { %p2631_p2 = scmp.ne.s32.totalorder %s3289_s2, %s2630_s22  ;;  %p2634_p3 = scmp.lt.u32.totalorder %s2630_s22, %s3289_s2 }
  0x2a   :  { %p2636_p4 = pnand %p2634_p3, %p2631_p2 }
  0x2c   :  { %2639 = shalt.err (!%p2636_p4)
}
  0x2d   :  { %s2640_s0 = scalar_lea.vmem %s44_s17, 256  ;;  %p2645_p6 = scmp.lt.s32.totalorder %s44_s17, %s44_s17 }
  0x2e   :  { %p2641_p5 = scmp.ne.s32.totalorder %s44_s17, %s2640_s0  ;;  %p2646_p7 = scmp.lt.s32.totalorder %s2640_s0, %s2640_s0 }
  0x30   :  { %p2647_p8 = por %p2646_p7, %p2645_p6 }
  0x32   :  { %p2648_p9 = pnand %p2647_p8, %p2641_p5 }
  0x34   :  { %2651 = shalt.err (!%p2648_p9)
}
  0x35   :  { %46 = dma.hbm_to_vmem [thread:$0]  %s3289_s2, 256, %s44_s17, [#allocation8]  }
  0x36   :  { %s2652_s5 = scalar_lea.hbm %s3290_s3, 256 }
  0x37   :  { %p2653_p10 = scmp.ne.s32.totalorder %s3290_s3, %s2652_s5  ;;  %p2656_p11 = scmp.lt.u32.totalorder %s2652_s5, %s3290_s3 }
  0x39   :  { %p2658_p12 = pnand %p2656_p11, %p2653_p10 }
  0x3b   :  { %2661 = shalt.err (!%p2658_p12)
}
  0x3c   :  { %s2662_s10 = scalar_lea.vmem %s54_s19, 256  ;;  %p2667_p0 = scmp.lt.s32.totalorder %s54_s19, %s54_s19 }
  0x3d   :  { %p2663_p13 = scmp.ne.s32.totalorder %s54_s19, %s2662_s10  ;;  %p2668_p1 = scmp.lt.s32.totalorder %s2662_s10, %s2662_s10 }
  0x3f   :  { %p2669_p2 = por %p2668_p1, %p2667_p0 }
  0x41   :  { %p2670_p3 = pnand %p2669_p2, %p2663_p13 }
  0x43   :  { %2673 = shalt.err (!%p2670_p3)
}
  0x44   :  { %56 = dma.hbm_to_vmem [thread:$0]  %s3290_s3, 256, %s54_s19, [#allocation11]  }
  0x45   :  { %2696 = dma.done.wait [#allocation5], 2048  }
  0x46   :  { %2697 = vsyncadd [#allocation5], 4294965248 }
  0x47   :  { %2698 = dma.done.wait [#allocation8], 4352  }
  0x48   :  { %2699 = vsyncadd [#allocation8], 4294962944 }
  0x49   :  { %2700 = dma.done.wait [#allocation11], 256  }
  0x4a   :  { %2701 = vsyncadd [#allocation11], 4294967040  ;;  %v2712_v0 = vmov 0.0|0.0   ;;  %v2793_v1 = vld [vmem:[#allocation7 + $0x4] ss:$8 sps:$4 sm:$0xff]   ;;  %v2956_v33 = vld [vmem:[#allocation10] sm:$0xff] }
  0x4b   :  { %311 = vmatprep.mubr.bf16.mxu0 %v2712_v0  ;;  %v2795_v2 = vld [vmem:[#allocation7] ss:$8 sps:$4 sm:$0xff]   ;;  %279 = vmatprep.subr.bf16.mxu0 %v2793_v1  ;;  %v2798_v3 = vld [vmem:[#allocation7 + $0x14] ss:$8 sps:$4 sm:$0xff]   ;;  %v2802_v4 = vld [vmem:[#allocation7 + $0x10] ss:$8 sps:$4 sm:$0xff]  }
  0x4c   :  { %536 = vmatprep.subr.bf16.mxu1 %v2793_v1  ;;  %280 = vmatpush1.bf16.msra.mxu0 %v2795_v2  ;;  %v2806_v5 = vld [vmem:[#allocation7 + $0x24] ss:$8 sps:$4 sm:$0xff]   ;;  %v2810_v6 = vld [vmem:[#allocation7 + $0x20] ss:$8 sps:$4 sm:$0xff]   ;;  %v2814_v7 = vld [vmem:[#allocation7 + $0x34] ss:$8 sps:$4 sm:$0xff]  }
  0x4d   :  { %537 = vmatpush1.bf16.msra.mxu1 %v2795_v2  ;;  %281 = vmatprep.subr.bf16.mxu0 %v2798_v3  ;;  %v2818_v8 = vld [vmem:[#allocation7 + $0x30] ss:$8 sps:$4 sm:$0xff]   ;;  %v2822_v9 = vld [vmem:[#allocation7 + $0x44] ss:$8 sps:$4 sm:$0xff]   ;;  %v2826_v10 = vld [vmem:[#allocation7 + $0x40] ss:$8 sps:$4 sm:$0xff]  }
  0x4e   :  { %538 = vmatprep.subr.bf16.mxu1 %v2798_v3  ;;  %v2830_v11 = vld [vmem:[#allocation7 + $0x54] ss:$8 sps:$4 sm:$0xff]   ;;  %v2834_v12 = vld [vmem:[#allocation7 + $0x50] ss:$8 sps:$4 sm:$0xff]   ;;  %v2838_v13 = vld [vmem:[#allocation7 + $0x64] ss:$8 sps:$4 sm:$0xff]  }
  0x4f   :  { %v2841_v14 = vld [vmem:[#allocation7 + $0x60] ss:$8 sps:$4 sm:$0xff]   ;;  %v2843_v15 = vld [vmem:[#allocation7 + $0x74] ss:$8 sps:$4 sm:$0xff]   ;;  %v2849_v16 = vld [vmem:[#allocation7 + $0x70] ss:$8 sps:$4 sm:$0xff]  }
  0x50   :  { %282 = vmatpush1.bf16.msra.mxu0 %v2802_v4  ;;  %v2851_v17 = vld [vmem:[#allocation7 + $0x84] ss:$8 sps:$4 sm:$0xff]   ;;  %v2857_v18 = vld [vmem:[#allocation7 + $0x80] ss:$8 sps:$4 sm:$0xff]   ;;  %v2862_v19 = vld [vmem:[#allocation7 + $0x94] ss:$8 sps:$4 sm:$0xff]  }
  0x51   :  { %539 = vmatpush1.bf16.msra.mxu1 %v2802_v4  ;;  %283 = vmatprep.subr.bf16.mxu0 %v2806_v5  ;;  %v2866_v20 = vld [vmem:[#allocation7 + $0x90] ss:$8 sps:$4 sm:$0xff]   ;;  %v2870_v21 = vld [vmem:[#allocation7 + $0xa4] ss:$8 sps:$4 sm:$0xff]   ;;  %v2874_v22 = vld [vmem:[#allocation7 + $0xa0] ss:$8 sps:$4 sm:$0xff]  }
  0x52   :  { %540 = vmatprep.subr.bf16.mxu1 %v2806_v5  ;;  %v2878_v23 = vld [vmem:[#allocation7 + $0xb4] ss:$8 sps:$4 sm:$0xff]   ;;  %v2882_v24 = vld [vmem:[#allocation7 + $0xb0] ss:$8 sps:$4 sm:$0xff]   ;;  %v2886_v25 = vld [vmem:[#allocation7 + $0xc4] ss:$8 sps:$4 sm:$0xff]  }
  0x53   :  { %v2890_v26 = vld [vmem:[#allocation7 + $0xc0] ss:$8 sps:$4 sm:$0xff]   ;;  %v2894_v27 = vld [vmem:[#allocation7 + $0xd4] ss:$8 sps:$4 sm:$0xff]   ;;  %v2898_v28 = vld [vmem:[#allocation7 + $0xd0] ss:$8 sps:$4 sm:$0xff]  }
  0x54   :  { %284 = vmatpush1.bf16.msra.mxu0 %v2810_v6  ;;  %v2902_v29 = vld [vmem:[#allocation7 + $0xe4] ss:$8 sps:$4 sm:$0xff]   ;;  %v2906_v30 = vld [vmem:[#allocation7 + $0xe0] ss:$8 sps:$4 sm:$0xff]   ;;  %v2910_v31 = vld [vmem:[#allocation7 + $0xf4] ss:$8 sps:$4 sm:$0xff]  }
  0x55   :  { %541 = vmatpush1.bf16.msra.mxu1 %v2810_v6  ;;  %285 = vmatprep.subr.bf16.mxu0 %v2814_v7  ;;  %v2914_v32 = vld [vmem:[#allocation7 + $0xf0] ss:$8 sps:$4 sm:$0xff]   ;;  %v320_v35 = vmul.f32 0.0, %v2956_v33  ;;  %v322_v36 = vld [vmem:[#allocation4] sm:$0xff]  ;;  %v323_v38 = vld [vmem:[#allocation4 + $0x8] sm:$0xff]  ;;  %v2713_v51 = vmov 0.0  }
  0x56   :  { %542 = vmatprep.subr.bf16.mxu1 %v2814_v7  ;;  %v2958_v34 = vld [vmem:[#allocation10 + $0x8] sm:$0xff]  ;;  %v2962_v41 = vld [vmem:[#allocation9] sm:$0xff]  ;;  %v2964_v44 = vld [vmem:[#allocation9 + $0x8] sm:$0xff]  ;;  %v2714_v54 = vmov 1.0|1.0   ;;  %s2715_s3 = smov [#allocation12]  }
  0x57   :  { %v321_v37 = vmul.f32 0.0, %v2958_v34  ;;  %v324_v39 = vadd.f32 %v322_v36, %v320_v35  ;;  %v580_v56 = vld [vmem:[#allocation4 + $0x10] sm:$0xff]  ;;  %v581_v58 = vld [vmem:[#allocation4 + $0x18] sm:$0xff]  ;;  %s2164_s12 = sshll.u32 %s2715_s3, 4  ;;  %s2165_s12 = int_to_ptr.vmem [resolvable:$true] %s2164_s12 }
  0x58   :  { %286 = vmatpush1.bf16.msra.mxu0 %v2818_v8  ;;  %s2674_s14 = scalar_lea.vmem %s2165_s12, 2048  ;;  %p2679_p5 = scmp.lt.s32.totalorder %s2165_s12, %s2165_s12 }
  0x59   :  { %543 = vmatpush1.bf16.msra.mxu1 %v2818_v8  ;;  %287 = vmatprep.subr.bf16.mxu0 %v2822_v9  ;;  %v325_v40 = vadd.f32 %v323_v38, %v321_v37  ;;  %p2675_p4 = scmp.ne.s32.totalorder %s2165_s12, %s2674_s14  ;;  %p2680_p6 = scmp.lt.s32.totalorder %s2674_s14, %s2674_s14 }
  0x5a   :  { %544 = vmatprep.subr.bf16.mxu1 %v2822_v9 }
  0x5b   :  { %p2681_p7 = por %p2680_p6, %p2679_p5 }
  0x5c   :  { %288 = vmatpush1.bf16.msra.mxu0 %v2826_v10 }
  0x5d   :  { %545 = vmatpush1.bf16.msra.mxu1 %v2826_v10  ;;  %289 = vmatprep.subr.bf16.mxu0 %v2830_v11  ;;  %p2682_p8 = pnand %p2681_p7, %p2675_p4 }
  0x5e   :  { %546 = vmatprep.subr.bf16.mxu1 %v2830_v11 }
  0x60   :  { %290 = vmatpush1.bf16.msra.mxu0 %v2834_v12 }
  0x61   :  { %547 = vmatpush1.bf16.msra.mxu1 %v2834_v12  ;;  %291 = vmatprep.subr.bf16.mxu0 %v2838_v13 }
  0x62   :  { %548 = vmatprep.subr.bf16.mxu1 %v2838_v13 }
  0x64   :  { %292 = vmatpush1.bf16.msra.mxu0 %v2841_v14 }
  0x65   :  { %549 = vmatpush1.bf16.msra.mxu1 %v2841_v14  ;;  %293 = vmatprep.subr.bf16.mxu0 %v2843_v15 }
  0x66   :  { %550 = vmatprep.subr.bf16.mxu1 %v2843_v15 }
  0x68   :  { %294 = vmatpush1.bf16.msra.mxu0 %v2849_v16 }
  0x69   :  { %551 = vmatpush1.bf16.msra.mxu1 %v2849_v16  ;;  %295 = vmatprep.subr.bf16.mxu0 %v2851_v17 }
  0x6a   :  { %552 = vmatprep.subr.bf16.mxu1 %v2851_v17 }
  0x6c   :  { %296 = vmatpush1.bf16.msra.mxu0 %v2857_v18 }
  0x6d   :  { %553 = vmatpush1.bf16.msra.mxu1 %v2857_v18  ;;  %297 = vmatprep.subr.bf16.mxu0 %v2862_v19 }
  0x6e   :  { %554 = vmatprep.subr.bf16.mxu1 %v2862_v19 }
  0x70   :  { %298 = vmatpush1.bf16.msra.mxu0 %v2866_v20 }
  0x71   :  { %555 = vmatpush1.bf16.msra.mxu1 %v2866_v20  ;;  %299 = vmatprep.subr.bf16.mxu0 %v2870_v21 }
  0x72   :  { %556 = vmatprep.subr.bf16.mxu1 %v2870_v21 }
  0x74   :  { %300 = vmatpush1.bf16.msra.mxu0 %v2874_v22 }
  0x75   :  { %557 = vmatpush1.bf16.msra.mxu1 %v2874_v22  ;;  %301 = vmatprep.subr.bf16.mxu0 %v2878_v23 }
  0x76   :  { %558 = vmatprep.subr.bf16.mxu1 %v2878_v23 }
  0x78   :  { %302 = vmatpush1.bf16.msra.mxu0 %v2882_v24 }
  0x79   :  { %559 = vmatpush1.bf16.msra.mxu1 %v2882_v24  ;;  %303 = vmatprep.subr.bf16.mxu0 %v2886_v25 }
  0x7a   :  { %560 = vmatprep.subr.bf16.mxu1 %v2886_v25 }
  0x7c   :  { %304 = vmatpush1.bf16.msra.mxu0 %v2890_v26 }
  0x7d   :  { %561 = vmatpush1.bf16.msra.mxu1 %v2890_v26  ;;  %305 = vmatprep.subr.bf16.mxu0 %v2894_v27 }
  0x7e   :  { %562 = vmatprep.subr.bf16.mxu1 %v2894_v27 }
  0x80   :  { %306 = vmatpush1.bf16.msra.mxu0 %v2898_v28 }
  0x81   :  { %563 = vmatpush1.bf16.msra.mxu1 %v2898_v28  ;;  %307 = vmatprep.subr.bf16.mxu0 %v2902_v29 }
  0x82   :  { %564 = vmatprep.subr.bf16.mxu1 %v2902_v29 }
  0x84   :  { %308 = vmatpush1.bf16.msra.mxu0 %v2906_v30 }
  0x85   :  { %565 = vmatpush1.bf16.msra.mxu1 %v2906_v30  ;;  %309 = vmatprep.subr.bf16.mxu0 %v2910_v31 }
  0x86   :  { %566 = vmatprep.subr.bf16.mxu1 %v2910_v31 }
  0x88   :  { %310 = vmatpush1.bf16.msra.mxu0 %v2914_v32 }
  0x89   :  { %567 = vmatpush1.bf16.msra.mxu1 %v2914_v32  ;;  %795 = vmatprep.subr.bf16.mxu0 %v2793_v1 }
  0x8a   :  { %1054 = vmatprep.subr.bf16.mxu1 %v2793_v1 }
  0x8b   :  { %312 = vmatmul.mubr.bf16.vlgmr.msra.gmra.mrb[0].mxu0 %v2712_v0 }
  0x8c   :  { %796 = vmatpush1.bf16.msra.mxu0 %v2795_v2 }
  0x8d   :  { %797 = vmatprep.subr.bf16.mxu0 %v2798_v3 }
  0x90   :  { %798 = vmatpush1.bf16.msra.mxu0 %v2802_v4 }
  0x91   :  { %799 = vmatprep.subr.bf16.mxu0 %v2806_v5 }
  0x94   :  { %800 = vmatpush1.bf16.msra.mxu0 %v2810_v6 }
  0x95   :  { %801 = vmatprep.subr.bf16.mxu0 %v2814_v7 }
  0x98   :  { %802 = vmatpush1.bf16.msra.mxu0 %v2818_v8 }
  0x99   :  { %803 = vmatprep.subr.bf16.mxu0 %v2822_v9 }
  0x9c   :  { %804 = vmatpush1.bf16.msra.mxu0 %v2826_v10 }
  0x9d   :  { %805 = vmatprep.subr.bf16.mxu0 %v2830_v11 }
  0xa0   :  { %806 = vmatpush1.bf16.msra.mxu0 %v2834_v12 }
  0xa1   :  { %807 = vmatprep.subr.bf16.mxu0 %v2838_v13 }
  0xa4   :  { %808 = vmatpush1.bf16.msra.mxu0 %v2841_v14 }
  0xa5   :  { %809 = vmatprep.subr.bf16.mxu0 %v2843_v15 }
  0xa8   :  { %810 = vmatpush1.bf16.msra.mxu0 %v2849_v16 }
  0xa9   :  { %811 = vmatprep.subr.bf16.mxu0 %v2851_v17 }
  0xac   :  { %812 = vmatpush1.bf16.msra.mxu0 %v2857_v18 }
  0xad   :  { %813 = vmatprep.subr.bf16.mxu0 %v2862_v19 }
  0xb0   :  { %814 = vmatpush1.bf16.msra.mxu0 %v2866_v20 }
  0xb1   :  { %815 = vmatprep.subr.bf16.mxu0 %v2870_v21 }
  0xb4   :  { %816 = vmatpush1.bf16.msra.mxu0 %v2874_v22 }
  0xb5   :  { %817 = vmatprep.subr.bf16.mxu0 %v2878_v23 }
  0xb8   :  { %818 = vmatpush1.bf16.msra.mxu0 %v2882_v24 }
  0xb9   :  { %819 = vmatprep.subr.bf16.mxu0 %v2886_v25 }
  0xbc   :  { %820 = vmatpush1.bf16.msra.mxu0 %v2890_v26 }
  0xbd   :  { %821 = vmatprep.subr.bf16.mxu0 %v2894_v27 }
  0xc0   :  { %822 = vmatpush1.bf16.msra.mxu0 %v2898_v28 }
  0xc1   :  { %823 = vmatprep.subr.bf16.mxu0 %v2902_v29 }
  0xc4   :  { %824 = vmatpush1.bf16.msra.mxu0 %v2906_v30 }
  0xc5   :  { %825 = vmatprep.subr.bf16.mxu0 %v2910_v31 }
  0xc8   :  { %826 = vmatpush1.bf16.msra.mxu0 %v2914_v32 }
  0xc9   :  { %1313 = vmatprep.subr.bf16.mxu0 %v2793_v1 }
 0x15e   :  { %v313_v42 = vpop.f32.mrb[0].mxu0 }
 0x15f   :  { %v326_v43 = vadd.f32 %v324_v39, %v313_v42  ;;  %v315_v45 = vpop.f32.mrb[1].mxu0 }
 0x160   :  { %v327_v46 = vadd.f32 %v325_v40, %v315_v45  ;;  %v317_v47 = vpop.f32.mrb[2].mxu0  ;;  %v3104_v45 = vld [vmem:[#allocation7 + $0x74] ss:$8 sps:$4 sm:$0xff]  }
 0x161   :  { %v328_v48 = vadd.f32 %v326_v43, %v2962_v41  ;;  %v318_v49 = vpop.f32.mrb[3].mxu0  ;;  %v3101_v43 = vld [vmem:[#allocation7 + $0x60] ss:$8 sps:$4 sm:$0xff]   ;;  %v3110_v47 = vld [vmem:[#allocation7 + $0x84] ss:$8 sps:$4 sm:$0xff]  }
 0x162   :  { %v329_v50 = vadd.f32 %v327_v46, %v2964_v44  ;;  %v3107_v46 = vld [vmem:[#allocation7 + $0x70] ss:$8 sps:$4 sm:$0xff]   ;;  %v3116_v49 = vld [vmem:[#allocation7 + $0x94] ss:$8 sps:$4 sm:$0xff]  }
 0x163   :  { %vm334_vm0 = vcmp.gt.f32.partialorder %v328_v48, 1.0  ;;  %v577_v55 = vmul.f32 %v328_v48, %v2956_v33  ;;  %v3113_v48 = vld [vmem:[#allocation7 + $0x80] ss:$8 sps:$4 sm:$0xff]  }
 0x164   :  { %vm335_vm1 = vcmp.gt.f32.partialorder %v329_v50, 1.0  ;;  %v2210_v52 = vsel %vm334_vm0, 1.0, %v2713_v51  ;;  %vm2246_vm3 = vmpackc.low %vm334_vm0, %vm334_vm0  ;;  %v578_v57 = vmul.f32 %v329_v50, %v2958_v34  ;;  %v3119_v50 = vld [vmem:[#allocation7 + $0x90] ss:$8 sps:$4 sm:$0xff]  }
 0x165   :  { %v2211_v53 = vsel %vm335_vm1, 1.0, %v2713_v51  ;;  %vm2244_vm2 = vmpackc.low %vm335_vm1, %vm335_vm1  ;;  %340 = vst [vmem:[#allocation12] sm:$0xff] %v2210_v52  ;;  %v582_v59 = vadd.f32 %v580_v56, %v577_v55  ;;  %vm588_vm4 = vcmp.eq.f32.partialorder %v2210_v52, 0.0  ;;  %v3122_v52 = vld [vmem:[#allocation7 + $0xa4] ss:$8 sps:$4 sm:$0xff]  }
 0x166   :  { %341 = vst [vmem:[#allocation12 + $0x8] sm:$0xff] %v2211_v53  ;;  %2245 = vmatprep.mubr.msk.bf16.mxu1 %vm2244_vm2, %v2714_v54  ;;  %v583_v61 = vadd.f32 %v581_v58, %v578_v57  ;;  %vm589_vm5 = vcmp.eq.f32.partialorder %v2211_v53, 0.0  ;;  %v3125_v53 = vld [vmem:[#allocation7 + $0xa0] ss:$8 sps:$4 sm:$0xff]   ;;  %v3128_v55 = vld [vmem:[#allocation7 + $0xb4] ss:$8 sps:$4 sm:$0xff]  }
 0x167   :  { %2247 = vmatmul.mubr.msk.bf16.vlgmr.msra.gmra.mrb[0].mxu1 %vm2246_vm3, %v2714_v54  ;;  %v3131_v56 = vld [vmem:[#allocation7 + $0xb0] ss:$8 sps:$4 sm:$0xff]   ;;  %v3134_v57 = vld [vmem:[#allocation7 + $0xc4] ss:$8 sps:$4 sm:$0xff]   ;;  %v3137_v58 = vld [vmem:[#allocation7 + $0xc0] ss:$8 sps:$4 sm:$0xff]  }
 0x168   :  { %1055 = vmatpush1.bf16.msra.mxu1 %v2795_v2 }
 0x169   :  { %1056 = vmatprep.subr.bf16.mxu1 %v2798_v3 }
 0x16c   :  { %1057 = vmatpush1.bf16.msra.mxu1 %v2802_v4 }
 0x16d   :  { %1058 = vmatprep.subr.bf16.mxu1 %v2806_v5 }
 0x170   :  { %1059 = vmatpush1.bf16.msra.mxu1 %v2810_v6 }
 0x171   :  { %1060 = vmatprep.subr.bf16.mxu1 %v2814_v7 }
 0x174   :  { %1061 = vmatpush1.bf16.msra.mxu1 %v2818_v8 }
 0x175   :  { %1062 = vmatprep.subr.bf16.mxu1 %v2822_v9 }
 0x178   :  { %1063 = vmatpush1.bf16.msra.mxu1 %v2826_v10 }
 0x179   :  { %1064 = vmatprep.subr.bf16.mxu1 %v2830_v11 }
 0x17c   :  { %1065 = vmatpush1.bf16.msra.mxu1 %v2834_v12 }
 0x17d   :  { %1066 = vmatprep.subr.bf16.mxu1 %v2838_v13 }
 0x180   :  { %1067 = vmatpush1.bf16.msra.mxu1 %v2841_v14 }
 0x181   :  { %1068 = vmatprep.subr.bf16.mxu1 %v2843_v15 }
 0x184   :  { %1069 = vmatpush1.bf16.msra.mxu1 %v2849_v16 }
 0x185   :  { %1070 = vmatprep.subr.bf16.mxu1 %v2851_v17 }
 0x188   :  { %1071 = vmatpush1.bf16.msra.mxu1 %v2857_v18 }
 0x189   :  { %1072 = vmatprep.subr.bf16.mxu1 %v2862_v19 }
 0x18c   :  { %1073 = vmatpush1.bf16.msra.mxu1 %v2866_v20 }
 0x18d   :  { %1074 = vmatprep.subr.bf16.mxu1 %v2870_v21 }
 0x190   :  { %1075 = vmatpush1.bf16.msra.mxu1 %v2874_v22 }
 0x191   :  { %1076 = vmatprep.subr.bf16.mxu1 %v2878_v23 }
 0x194   :  { %1077 = vmatpush1.bf16.msra.mxu1 %v2882_v24 }
 0x195   :  { %1078 = vmatprep.subr.bf16.mxu1 %v2886_v25 }
 0x198   :  { %1079 = vmatpush1.bf16.msra.mxu1 %v2890_v26 }
 0x199   :  { %1080 = vmatprep.subr.bf16.mxu1 %v2894_v27 }
 0x19c   :  { %1081 = vmatpush1.bf16.msra.mxu1 %v2898_v28 }
 0x19d   :  { %1082 = vmatprep.subr.bf16.mxu1 %v2902_v29 }
 0x1a0   :  { %1083 = vmatpush1.bf16.msra.mxu1 %v2906_v30 }
 0x1a1   :  { %1084 = vmatprep.subr.bf16.mxu1 %v2910_v31 }
 0x1a4   :  { %1085 = vmatpush1.bf16.msra.mxu1 %v2914_v32 }
 0x23a   :  { %v570_v60 = vpop.f32.mrb[0].mxu1 }
 0x23b   :  { %v584_v62 = vadd.f32 %v582_v59, %v570_v60  ;;  %v572_v63 = vpop.f32.mrb[1].mxu1  ;;  %v3140_v59 = vld [vmem:[#allocation7 + $0xd4] ss:$8 sps:$4 sm:$0xff]   ;;  %v3143_v60 = vld [vmem:[#allocation7 + $0xd0] ss:$8 sps:$4 sm:$0xff]  }
 0x23c   :  { %v585_v0 = vadd.f32 %v583_v61, %v572_v63  ;;  %v574_v1 = vpop.f32.mrb[2].mxu1 }
 0x23d   :  { %v586_v35 = vadd.f32 %v584_v62, %v2962_v41  ;;  %v575_v36 = vpop.f32.mrb[3].mxu1  ;;  %v1098_v62 = vld [vmem:[#allocation4 + $0x30] sm:$0xff] }
 0x23e   :  { %v587_v37 = vadd.f32 %v585_v0, %v2964_v44  ;;  %v1099_v0 = vld [vmem:[#allocation4 + $0x38] sm:$0xff] }
 0x23f   :  { %v590_v38 = vsel %vm588_vm4, %v586_v35, 0.0 }
 0x240   :  { %vm592_vm6 = vcmp.gt.f32.partialorder %v590_v38, 1.0  ;;  %v591_v39 = vsel %vm589_vm5, %v587_v37, 0.0 }
 0x241   :  { %vm593_vm7 = vcmp.gt.f32.partialorder %v591_v39, 1.0  ;;  %v2248_v40 = vsel %vm592_vm6, 1.0, %v2713_v51  ;;  %vm2284_vm9 = vmpackc.low %vm592_vm6, %vm592_vm6 }
 0x242   :  { %v2249_v42 = vsel %vm593_vm7, 1.0, %v2713_v51  ;;  %vm2282_vm8 = vmpackc.low %vm593_vm7, %vm593_vm7  ;;  %599 = vst [vmem:[#allocation12 + $0x10] sm:$0xff] %v2248_v40  ;;  %vm847_vm10 = vcmp.eq.f32.partialorder %v2248_v40, 0.0 }
 0x243   :  { %600 = vst [vmem:[#allocation12 + $0x18] sm:$0xff] %v2249_v42  ;;  %2283 = vmatprep.mubr.msk.bf16.mxu0 %vm2282_vm8, %v2714_v54  ;;  %vm848_vm11 = vcmp.eq.f32.partialorder %v2249_v42, 0.0 }
 0x244   :  { %2285 = vmatmul.mubr.msk.bf16.vlgmr.msra.gmra.mrb[4].mxu0 %vm2284_vm9, %v2714_v54 }
 0x245   :  { %1314 = vmatpush1.bf16.msra.mxu0 %v2795_v2  ;;  %v836_v2 = vmul.f32 %v590_v38, %v2956_v33 }
 0x246   :  { %1315 = vmatprep.subr.bf16.mxu0 %v2798_v3  ;;  %v839_v3 = vld [vmem:[#allocation4 + $0x20] sm:$0xff] }
 0x249   :  { %1316 = vmatpush1.bf16.msra.mxu0 %v2802_v4  ;;  %v837_v4 = vmul.f32 %v591_v39, %v2958_v34 }
 0x24a   :  { %1317 = vmatprep.subr.bf16.mxu0 %v2806_v5  ;;  %v840_v5 = vld [vmem:[#allocation4 + $0x28] sm:$0xff] }
 0x24d   :  { %1318 = vmatpush1.bf16.msra.mxu0 %v2810_v6  ;;  %v841_v6 = vadd.f32 %v839_v3, %v836_v2 }
 0x24e   :  { %1319 = vmatprep.subr.bf16.mxu0 %v2814_v7 }
 0x251   :  { %1320 = vmatpush1.bf16.msra.mxu0 %v2818_v8  ;;  %v842_v8 = vadd.f32 %v840_v5, %v837_v4 }
 0x252   :  { %1321 = vmatprep.subr.bf16.mxu0 %v2822_v9 }
 0x255   :  { %1322 = vmatpush1.bf16.msra.mxu0 %v2826_v10 }
 0x256   :  { %1323 = vmatprep.subr.bf16.mxu0 %v2830_v11 }
 0x259   :  { %1324 = vmatpush1.bf16.msra.mxu0 %v2834_v12 }
 0x25a   :  { %1325 = vmatprep.subr.bf16.mxu0 %v2838_v13 }
 0x25d   :  { %1326 = vmatpush1.bf16.msra.mxu0 %v2841_v14 }
 0x25e   :  { %1327 = vmatprep.subr.bf16.mxu0 %v2843_v15 }
 0x261   :  { %1328 = vmatpush1.bf16.msra.mxu0 %v2849_v16 }
 0x262   :  { %1329 = vmatprep.subr.bf16.mxu0 %v2851_v17 }
 0x265   :  { %1330 = vmatpush1.bf16.msra.mxu0 %v2857_v18 }
 0x266   :  { %1331 = vmatprep.subr.bf16.mxu0 %v2862_v19 }
 0x269   :  { %1332 = vmatpush1.bf16.msra.mxu0 %v2866_v20  ;;  %v3062_v20 = vld [vmem:[#allocation7] ss:$8 sps:$4 sm:$0xff]  }
 0x26a   :  { %1333 = vmatprep.subr.bf16.mxu0 %v2870_v21  ;;  %v3064_v21 = vld [vmem:[#allocation7 + $0x4] ss:$8 sps:$4 sm:$0xff]  }
 0x26b   :  { %1572 = vmatprep.subr.bf16.mxu1 %v3064_v21 }
 0x26d   :  { %1334 = vmatpush1.bf16.msra.mxu0 %v2874_v22  ;;  %v3066_v22 = vld [vmem:[#allocation7 + $0x14] ss:$8 sps:$4 sm:$0xff]  }
 0x26e   :  { %1335 = vmatprep.subr.bf16.mxu0 %v2878_v23  ;;  %v3071_v23 = vld [vmem:[#allocation7 + $0x10] ss:$8 sps:$4 sm:$0xff]  }
 0x271   :  { %1336 = vmatpush1.bf16.msra.mxu0 %v2882_v24  ;;  %v3074_v24 = vld [vmem:[#allocation7 + $0x24] ss:$8 sps:$4 sm:$0xff]  }
 0x272   :  { %1337 = vmatprep.subr.bf16.mxu0 %v2886_v25  ;;  %v3077_v25 = vld [vmem:[#allocation7 + $0x20] ss:$8 sps:$4 sm:$0xff]  }
 0x275   :  { %1338 = vmatpush1.bf16.msra.mxu0 %v2890_v26  ;;  %v3080_v26 = vld [vmem:[#allocation7 + $0x34] ss:$8 sps:$4 sm:$0xff]  }
 0x276   :  { %1339 = vmatprep.subr.bf16.mxu0 %v2894_v27  ;;  %v3083_v27 = vld [vmem:[#allocation7 + $0x30] ss:$8 sps:$4 sm:$0xff]  }
 0x279   :  { %1340 = vmatpush1.bf16.msra.mxu0 %v2898_v28  ;;  %v3086_v28 = vld [vmem:[#allocation7 + $0x44] ss:$8 sps:$4 sm:$0xff]  }
 0x27a   :  { %1341 = vmatprep.subr.bf16.mxu0 %v2902_v29  ;;  %v3089_v29 = vld [vmem:[#allocation7 + $0x40] ss:$8 sps:$4 sm:$0xff]  }
 0x27d   :  { %1342 = vmatpush1.bf16.msra.mxu0 %v2906_v30  ;;  %v3092_v30 = vld [vmem:[#allocation7 + $0x54] ss:$8 sps:$4 sm:$0xff]  }
 0x27e   :  { %1343 = vmatprep.subr.bf16.mxu0 %v2910_v31  ;;  %v3095_v31 = vld [vmem:[#allocation7 + $0x50] ss:$8 sps:$4 sm:$0xff]  }
 0x281   :  { %1344 = vmatpush1.bf16.msra.mxu0 %v2914_v32  ;;  %v3098_v32 = vld [vmem:[#allocation7 + $0x64] ss:$8 sps:$4 sm:$0xff]  }
 0x282   :  { %1831 = vmatprep.subr.bf16.mxu0 %v3064_v21 }
 0x317   :  { %v829_v7 = vpop.f32.mrb[4].mxu0 }
 0x318   :  { %v843_v9 = vadd.f32 %v841_v6, %v829_v7  ;;  %v831_v10 = vpop.f32.mrb[5].mxu0 }
 0x319   :  { %v844_v11 = vadd.f32 %v842_v8, %v831_v10  ;;  %v833_v12 = vpop.f32.mrb[6].mxu0  ;;  %v3192_v8 = vld [vmem:[#allocation7 + $0xe4] ss:$8 sps:$4 sm:$0xff]   ;;  %v3200_v10 = vld [vmem:[#allocation7 + $0xf4] ss:$8 sps:$4 sm:$0xff]  }
 0x31a   :  { %v845_v13 = vadd.f32 %v843_v9, %v2962_v41  ;;  %v834_v14 = vpop.f32.mrb[7].mxu0  ;;  %v3194_v9 = vld [vmem:[#allocation7 + $0xe0] ss:$8 sps:$4 sm:$0xff]  }
 0x31b   :  { %v846_v15 = vadd.f32 %v844_v11, %v2964_v44  ;;  %v3202_v11 = vld [vmem:[#allocation7 + $0xf0] ss:$8 sps:$4 sm:$0xff]  }
 0x31c   :  { %v3046_v16 = vsel %vm847_vm10, %v845_v13, 0.0  ;;  %v1357_v13 = vld [vmem:[#allocation4 + $0x40] sm:$0xff] }
 0x31d   :  { %vm851_vm12 = vcmp.gt.f32.partialorder %v3046_v16, 1.0  ;;  %v3049_v17 = vsel %vm848_vm11, %v846_v15, 0.0  ;;  %v1095_v61 = vmul.f32 %v3046_v16, %v2956_v33  ;;  %v1358_v15 = vld [vmem:[#allocation4 + $0x48] sm:$0xff] }
 0x31e   :  { %vm852_vm13 = vcmp.gt.f32.partialorder %v3049_v17, 1.0  ;;  %v3053_v18 = vsel %vm851_vm12, 1.0, %v2713_v51  ;;  %vm2322_vm15 = vmpackc.low %vm851_vm12, %vm851_vm12  ;;  %v1096_v63 = vmul.f32 %v3049_v17, %v2958_v34 }
 0x31f   :  { %v3056_v19 = vsel %vm852_vm13, 1.0, %v2713_v51  ;;  %vm2320_vm14 = vmpackc.low %vm852_vm13, %vm852_vm13  ;;  %858 = vst [vmem:[#allocation12 + $0x20] sm:$0xff] %v3053_v18  ;;  %v1100_v1 = vadd.f32 %v1098_v62, %v1095_v61  ;;  %vm1106_vm0 = vcmp.eq.f32.partialorder %v3053_v18, 0.0 }
 0x320   :  { %859 = vst [vmem:[#allocation12 + $0x28] sm:$0xff] %v3056_v19  ;;  %2321 = vmatprep.mubr.msk.bf16.mxu1 %vm2320_vm14, %v2714_v54  ;;  %v1101_v36 = vadd.f32 %v1099_v0, %v1096_v63  ;;  %vm1107_vm1 = vcmp.eq.f32.partialorder %v3056_v19, 0.0 }
 0x321   :  { %2323 = vmatmul.mubr.msk.bf16.vlgmr.msra.gmra.mrb[4].mxu1 %vm2322_vm15, %v2714_v54 }
 0x322   :  { %1573 = vmatpush1.bf16.msra.mxu1 %v3062_v20 }
 0x323   :  { %1574 = vmatprep.subr.bf16.mxu1 %v3066_v22 }
 0x326   :  { %1575 = vmatpush1.bf16.msra.mxu1 %v3071_v23 }
 0x327   :  { %1576 = vmatprep.subr.bf16.mxu1 %v3074_v24 }
 0x32a   :  { %1577 = vmatpush1.bf16.msra.mxu1 %v3077_v25 }
 0x32b   :  { %1578 = vmatprep.subr.bf16.mxu1 %v3080_v26 }
 0x32e   :  { %1579 = vmatpush1.bf16.msra.mxu1 %v3083_v27 }
 0x32f   :  { %1580 = vmatprep.subr.bf16.mxu1 %v3086_v28 }
 0x332   :  { %1581 = vmatpush1.bf16.msra.mxu1 %v3089_v29 }
 0x333   :  { %1582 = vmatprep.subr.bf16.mxu1 %v3092_v30 }
 0x336   :  { %1583 = vmatpush1.bf16.msra.mxu1 %v3095_v31 }
 0x337   :  { %1584 = vmatprep.subr.bf16.mxu1 %v3098_v32 }
 0x33a   :  { %1585 = vmatpush1.bf16.msra.mxu1 %v3101_v43 }
 0x33b   :  { %1586 = vmatprep.subr.bf16.mxu1 %v3104_v45 }
 0x33e   :  { %1587 = vmatpush1.bf16.msra.mxu1 %v3107_v46 }
 0x33f   :  { %1588 = vmatprep.subr.bf16.mxu1 %v3110_v47 }
 0x342   :  { %1589 = vmatpush1.bf16.msra.mxu1 %v3113_v48 }
 0x343   :  { %1590 = vmatprep.subr.bf16.mxu1 %v3116_v49 }
 0x346   :  { %1591 = vmatpush1.bf16.msra.mxu1 %v3119_v50 }
 0x347   :  { %1592 = vmatprep.subr.bf16.mxu1 %v3122_v52 }
 0x34a   :  { %1593 = vmatpush1.bf16.msra.mxu1 %v3125_v53 }
 0x34b   :  { %1594 = vmatprep.subr.bf16.mxu1 %v3128_v55 }
 0x34e   :  { %1595 = vmatpush1.bf16.msra.mxu1 %v3131_v56 }
 0x34f   :  { %1596 = vmatprep.subr.bf16.mxu1 %v3134_v57 }
 0x352   :  { %1597 = vmatpush1.bf16.msra.mxu1 %v3137_v58 }
 0x353   :  { %1598 = vmatprep.subr.bf16.mxu1 %v3140_v59 }
 0x356   :  { %1599 = vmatpush1.bf16.msra.mxu1 %v3143_v60 }
 0x357   :  { %1600 = vmatprep.subr.bf16.mxu1 %v3192_v8 }
 0x35a   :  { %1601 = vmatpush1.bf16.msra.mxu1 %v3194_v9 }
 0x35b   :  { %1602 = vmatprep.subr.bf16.mxu1 %v3200_v10 }
 0x35e   :  { %1603 = vmatpush1.bf16.msra.mxu1 %v3202_v11 }
 0x35f   :  { %2090 = vmatprep.subr.bf16.mxu1 %v3064_v21 }
 0x3f4   :  { %v1088_v35 = vpop.f32.mrb[4].mxu1 }
 0x3f5   :  { %v1102_v37 = vadd.f32 %v1100_v1, %v1088_v35  ;;  %v1090_v38 = vpop.f32.mrb[5].mxu1 }
 0x3f6   :  { %v1103_v39 = vadd.f32 %v1101_v36, %v1090_v38  ;;  %v1092_v40 = vpop.f32.mrb[6].mxu1 }
 0x3f7   :  { %v1104_v42 = vadd.f32 %v1102_v37, %v2962_v41  ;;  %v1093_v2 = vpop.f32.mrb[7].mxu1 }
 0x3f8   :  { %v1105_v3 = vadd.f32 %v1103_v39, %v2964_v44 }
 0x3f9   :  { %v1108_v4 = vsel %vm1106_vm0, %v1104_v42, 0.0 }
 0x3fa   :  { %vm1110_vm2 = vcmp.gt.f32.partialorder %v1108_v4, 1.0  ;;  %v1109_v5 = vsel %vm1107_vm1, %v1105_v3, 0.0  ;;  %v1354_v12 = vmul.f32 %v1108_v4, %v2956_v33 }
 0x3fb   :  { %vm1111_vm3 = vcmp.gt.f32.partialorder %v1109_v5, 1.0  ;;  %v3156_v6 = vsel %vm1110_vm2, 1.0, %v2713_v51  ;;  %vm2360_vm5 = vmpackc.low %vm1110_vm2, %vm1110_vm2  ;;  %v1355_v14 = vmul.f32 %v1109_v5, %v2958_v34 }
 0x3fc   :  { %v3159_v7 = vsel %vm1111_vm3, 1.0, %v2713_v51  ;;  %vm2358_vm4 = vmpackc.low %vm1111_vm3, %vm1111_vm3  ;;  %1117 = vst [vmem:[#allocation12 + $0x30] sm:$0xff] %v3156_v6  ;;  %v1359_v16 = vadd.f32 %v1357_v13, %v1354_v12  ;;  %vm1365_vm6 = vcmp.eq.f32.partialorder %v3156_v6, 0.0 }
 0x3fd   :  { %1118 = vst [vmem:[#allocation12 + $0x38] sm:$0xff] %v3159_v7  ;;  %2359 = vmatprep.mubr.msk.bf16.mxu0 %vm2358_vm4, %v2714_v54  ;;  %v1360_v18 = vadd.f32 %v1358_v15, %v1355_v14  ;;  %vm1366_vm7 = vcmp.eq.f32.partialorder %v3159_v7, 0.0 }
 0x3fe   :  { %2361 = vmatmul.mubr.msk.bf16.vlgmr.msra.gmra.mrb[8].mxu0 %vm2360_vm5, %v2714_v54 }
 0x3ff   :  { %1832 = vmatpush1.bf16.msra.mxu0 %v3062_v20 }
 0x400   :  { %1833 = vmatprep.subr.bf16.mxu0 %v3066_v22 }
 0x403   :  { %1834 = vmatpush1.bf16.msra.mxu0 %v3071_v23 }
 0x404   :  { %1835 = vmatprep.subr.bf16.mxu0 %v3074_v24 }
 0x407   :  { %1836 = vmatpush1.bf16.msra.mxu0 %v3077_v25 }
 0x408   :  { %1837 = vmatprep.subr.bf16.mxu0 %v3080_v26 }
 0x40b   :  { %1838 = vmatpush1.bf16.msra.mxu0 %v3083_v27 }
 0x40c   :  { %1839 = vmatprep.subr.bf16.mxu0 %v3086_v28 }
 0x40f   :  { %1840 = vmatpush1.bf16.msra.mxu0 %v3089_v29 }
 0x410   :  { %1841 = vmatprep.subr.bf16.mxu0 %v3092_v30 }
 0x413   :  { %1842 = vmatpush1.bf16.msra.mxu0 %v3095_v31 }
 0x414   :  { %1843 = vmatprep.subr.bf16.mxu0 %v3098_v32 }
 0x417   :  { %1844 = vmatpush1.bf16.msra.mxu0 %v3101_v43 }
 0x418   :  { %1845 = vmatprep.subr.bf16.mxu0 %v3104_v45 }
 0x41b   :  { %1846 = vmatpush1.bf16.msra.mxu0 %v3107_v46 }
 0x41c   :  { %1847 = vmatprep.subr.bf16.mxu0 %v3110_v47 }
 0x41f   :  { %1848 = vmatpush1.bf16.msra.mxu0 %v3113_v48 }
 0x420   :  { %1849 = vmatprep.subr.bf16.mxu0 %v3116_v49 }
 0x423   :  { %1850 = vmatpush1.bf16.msra.mxu0 %v3119_v50 }
 0x424   :  { %1851 = vmatprep.subr.bf16.mxu0 %v3122_v52 }
 0x427   :  { %1852 = vmatpush1.bf16.msra.mxu0 %v3125_v53 }
 0x428   :  { %1853 = vmatprep.subr.bf16.mxu0 %v3128_v55 }
 0x42b   :  { %1854 = vmatpush1.bf16.msra.mxu0 %v3131_v56 }
 0x42c   :  { %1855 = vmatprep.subr.bf16.mxu0 %v3134_v57 }
 0x42f   :  { %1856 = vmatpush1.bf16.msra.mxu0 %v3137_v58 }
 0x430   :  { %1857 = vmatprep.subr.bf16.mxu0 %v3140_v59 }
 0x433   :  { %1858 = vmatpush1.bf16.msra.mxu0 %v3143_v60 }
 0x434   :  { %1859 = vmatprep.subr.bf16.mxu0 %v3192_v8 }
 0x437   :  { %1860 = vmatpush1.bf16.msra.mxu0 %v3194_v9 }
 0x438   :  { %1861 = vmatprep.subr.bf16.mxu0 %v3200_v10 }
 0x43b   :  { %1862 = vmatpush1.bf16.msra.mxu0 %v3202_v11 }
 0x4d1   :  { %v1347_v17 = vpop.f32.mrb[8].mxu0 }
 0x4d2   :  { %v1361_v19 = vadd.f32 %v1359_v16, %v1347_v17  ;;  %v1349_v61 = vpop.f32.mrb[9].mxu0 }
 0x4d3   :  { %v1362_v62 = vadd.f32 %v1360_v18, %v1349_v61  ;;  %v1351_v63 = vpop.f32.mrb[10].mxu0 }
 0x4d4   :  { %v1363_v0 = vadd.f32 %v1361_v19, %v2962_v41  ;;  %v1352_v1 = vpop.f32.mrb[11].mxu0 }
 0x4d5   :  { %v1364_v21 = vadd.f32 %v1362_v62, %v2964_v44 }
 0x4d6   :  { %v1367_v35 = vsel %vm1365_vm6, %v1363_v0, 0.0 }
 0x4d7   :  { %vm1369_vm8 = vcmp.gt.f32.partialorder %v1367_v35, 1.0  ;;  %v1368_v36 = vsel %vm1366_vm7, %v1364_v21, 0.0 }
 0x4d8   :  { %vm1370_vm9 = vcmp.gt.f32.partialorder %v1368_v36, 1.0  ;;  %v2362_v37 = vsel %vm1369_vm8, 1.0, %v2713_v51  ;;  %vm2398_vm11 = vmpackc.low %vm1369_vm8, %vm1369_vm8 }
 0x4d9   :  { %v2363_v38 = vsel %vm1370_vm9, 1.0, %v2713_v51  ;;  %vm2396_vm10 = vmpackc.low %vm1370_vm9, %vm1370_vm9  ;;  %1376 = vst [vmem:[#allocation12 + $0x40] sm:$0xff] %v2362_v37  ;;  %vm1624_vm12 = vcmp.eq.f32.partialorder %v2362_v37, 0.0 }
 0x4da   :  { %1377 = vst [vmem:[#allocation12 + $0x48] sm:$0xff] %v2363_v38  ;;  %2397 = vmatprep.mubr.msk.bf16.mxu1 %vm2396_vm10, %v2714_v54  ;;  %vm1625_vm13 = vcmp.eq.f32.partialorder %v2363_v38, 0.0 }
 0x4db   :  { %2399 = vmatmul.mubr.msk.bf16.vlgmr.msra.gmra.mrb[8].mxu1 %vm2398_vm11, %v2714_v54 }
 0x4dc   :  { %2091 = vmatpush1.bf16.msra.mxu1 %v3062_v20  ;;  %v1613_v20 = vmul.f32 %v1367_v35, %v2956_v33 }
 0x4dd   :  { %2092 = vmatprep.subr.bf16.mxu1 %v3066_v22  ;;  %v1616_v22 = vld [vmem:[#allocation4 + $0x50] sm:$0xff] }
 0x4e0   :  { %2093 = vmatpush1.bf16.msra.mxu1 %v3071_v23  ;;  %v1614_v23 = vmul.f32 %v1368_v36, %v2958_v34 }
 0x4e1   :  { %2094 = vmatprep.subr.bf16.mxu1 %v3074_v24  ;;  %v1617_v24 = vld [vmem:[#allocation4 + $0x58] sm:$0xff] }
 0x4e4   :  { %2095 = vmatpush1.bf16.msra.mxu1 %v3077_v25  ;;  %v1618_v25 = vadd.f32 %v1616_v22, %v1613_v20 }
 0x4e5   :  { %2096 = vmatprep.subr.bf16.mxu1 %v3080_v26 }
 0x4e8   :  { %2097 = vmatpush1.bf16.msra.mxu1 %v3083_v27  ;;  %v1619_v27 = vadd.f32 %v1617_v24, %v1614_v23 }
 0x4e9   :  { %2098 = vmatprep.subr.bf16.mxu1 %v3086_v28 }
 0x4ec   :  { %2099 = vmatpush1.bf16.msra.mxu1 %v3089_v29 }
 0x4ed   :  { %2100 = vmatprep.subr.bf16.mxu1 %v3092_v30 }
 0x4f0   :  { %2101 = vmatpush1.bf16.msra.mxu1 %v3095_v31 }
 0x4f1   :  { %2102 = vmatprep.subr.bf16.mxu1 %v3098_v32 }
 0x4f4   :  { %2103 = vmatpush1.bf16.msra.mxu1 %v3101_v43 }
 0x4f5   :  { %2104 = vmatprep.subr.bf16.mxu1 %v3104_v45 }
 0x4f8   :  { %2105 = vmatpush1.bf16.msra.mxu1 %v3107_v46 }
 0x4f9   :  { %2106 = vmatprep.subr.bf16.mxu1 %v3110_v47 }
 0x4fc   :  { %2107 = vmatpush1.bf16.msra.mxu1 %v3113_v48 }
 0x4fd   :  { %2108 = vmatprep.subr.bf16.mxu1 %v3116_v49 }
 0x500   :  { %2109 = vmatpush1.bf16.msra.mxu1 %v3119_v50 }
 0x501   :  { %2110 = vmatprep.subr.bf16.mxu1 %v3122_v52  ;;  %v1875_v52 = vld [vmem:[#allocation4 + $0x60] sm:$0xff] }
 0x504   :  { %2111 = vmatpush1.bf16.msra.mxu1 %v3125_v53 }
 0x505   :  { %2112 = vmatprep.subr.bf16.mxu1 %v3128_v55  ;;  %v1876_v55 = vld [vmem:[#allocation4 + $0x68] sm:$0xff] }
 0x508   :  { %2113 = vmatpush1.bf16.msra.mxu1 %v3131_v56 }
 0x509   :  { %2114 = vmatprep.subr.bf16.mxu1 %v3134_v57 }
 0x50c   :  { %2115 = vmatpush1.bf16.msra.mxu1 %v3137_v58 }
 0x50d   :  { %2116 = vmatprep.subr.bf16.mxu1 %v3140_v59 }
 0x510   :  { %2117 = vmatpush1.bf16.msra.mxu1 %v3143_v60 }
 0x511   :  { %2118 = vmatprep.subr.bf16.mxu1 %v3192_v8 }
 0x514   :  { %2119 = vmatpush1.bf16.msra.mxu1 %v3194_v9  ;;  %v2134_v9 = vld [vmem:[#allocation4 + $0x70] sm:$0xff] }
 0x515   :  { %2120 = vmatprep.subr.bf16.mxu1 %v3200_v10 }
 0x518   :  { %2121 = vmatpush1.bf16.msra.mxu1 %v3202_v11  ;;  %v2135_v11 = vld [vmem:[#allocation4 + $0x78] sm:$0xff] }
 0x5ae   :  { %v1606_v26 = vpop.f32.mrb[8].mxu1 }
 0x5af   :  { %v1620_v28 = vadd.f32 %v1618_v25, %v1606_v26  ;;  %v1608_v29 = vpop.f32.mrb[9].mxu1 }
 0x5b0   :  { %v1621_v30 = vadd.f32 %v1619_v27, %v1608_v29  ;;  %v1610_v31 = vpop.f32.mrb[10].mxu1 }
 0x5b1   :  { %v1622_v32 = vadd.f32 %v1620_v28, %v2962_v41  ;;  %v1611_v43 = vpop.f32.mrb[11].mxu1 }
 0x5b2   :  { %v1623_v45 = vadd.f32 %v1621_v30, %v2964_v44 }
 0x5b3   :  { %v1626_v46 = vsel %vm1624_vm12, %v1622_v32, 0.0 }
 0x5b4   :  { %vm1628_vm14 = vcmp.gt.f32.partialorder %v1626_v46, 1.0  ;;  %v1627_v47 = vsel %vm1625_vm13, %v1623_v45, 0.0  ;;  %v1872_v50 = vmul.f32 %v1626_v46, %v2956_v33 }
 0x5b5   :  { %vm1629_vm15 = vcmp.gt.f32.partialorder %v1627_v47, 1.0  ;;  %v2400_v48 = vsel %vm1628_vm14, 1.0, %v2713_v51  ;;  %vm2436_vm1 = vmpackc.low %vm1628_vm14, %vm1628_vm14  ;;  %v1873_v53 = vmul.f32 %v1627_v47, %v2958_v34 }
 0x5b6   :  { %v2401_v49 = vsel %vm1629_vm15, 1.0, %v2713_v51  ;;  %vm2434_vm0 = vmpackc.low %vm1629_vm15, %vm1629_vm15  ;;  %1635 = vst [vmem:[#allocation12 + $0x50] sm:$0xff] %v2400_v48  ;;  %v1877_v56 = vadd.f32 %v1875_v52, %v1872_v50  ;;  %vm1883_vm2 = vcmp.eq.f32.partialorder %v2400_v48, 0.0 }
 0x5b7   :  { %1636 = vst [vmem:[#allocation12 + $0x58] sm:$0xff] %v2401_v49  ;;  %2435 = vmatprep.mubr.msk.bf16.mxu0 %vm2434_vm0, %v2714_v54  ;;  %v1878_v58 = vadd.f32 %v1876_v55, %v1873_v53  ;;  %vm1884_vm3 = vcmp.eq.f32.partialorder %v2401_v49, 0.0 }
 0x5b8   :  { %2437 = vmatmul.mubr.msk.bf16.vlgmr.msra.gmra.mrb[12].mxu0 %vm2436_vm1, %v2714_v54 }
 0x68b   :  { %v1865_v57 = vpop.f32.mrb[12].mxu0 }
 0x68c   :  { %v1879_v59 = vadd.f32 %v1877_v56, %v1865_v57  ;;  %v1867_v60 = vpop.f32.mrb[13].mxu0 }
 0x68d   :  { %v1880_v39 = vadd.f32 %v1878_v58, %v1867_v60  ;;  %v1869_v40 = vpop.f32.mrb[14].mxu0 }
 0x68e   :  { %v1881_v42 = vadd.f32 %v1879_v59, %v2962_v41  ;;  %v1870_v2 = vpop.f32.mrb[15].mxu0 }
 0x68f   :  { %v1882_v3 = vadd.f32 %v1880_v39, %v2964_v44 }
 0x690   :  { %v1885_v4 = vsel %vm1883_vm2, %v1881_v42, 0.0 }
 0x691   :  { %vm1887_vm4 = vcmp.gt.f32.partialorder %v1885_v4, 1.0  ;;  %v1886_v5 = vsel %vm1884_vm3, %v1882_v3, 0.0  ;;  %v2131_v8 = vmul.f32 %v1885_v4, %v2956_v33 }
 0x692   :  { %vm1888_vm5 = vcmp.gt.f32.partialorder %v1886_v5, 1.0  ;;  %v2438_v6 = vsel %vm1887_vm4, 1.0, %v2713_v51  ;;  %vm2474_vm7 = vmpackc.low %vm1887_vm4, %vm1887_vm4  ;;  %v2132_v10 = vmul.f32 %v1886_v5, %v2958_v34 }
 0x693   :  { %v2439_v7 = vsel %vm1888_vm5, 1.0, %v2713_v51  ;;  %vm2472_vm6 = vmpackc.low %vm1888_vm5, %vm1888_vm5  ;;  %1894 = vst [vmem:[#allocation12 + $0x60] sm:$0xff] %v2438_v6  ;;  %v2136_v12 = vadd.f32 %v2134_v9, %v2131_v8  ;;  %vm2142_vm8 = vcmp.eq.f32.partialorder %v2438_v6, 0.0 }
 0x694   :  { %1895 = vst [vmem:[#allocation12 + $0x68] sm:$0xff] %v2439_v7  ;;  %2473 = vmatprep.mubr.msk.bf16.mxu1 %vm2472_vm6, %v2714_v54  ;;  %v2137_v14 = vadd.f32 %v2135_v11, %v2132_v10  ;;  %vm2143_vm9 = vcmp.eq.f32.partialorder %v2439_v7, 0.0 }
 0x695   :  { %2475 = vmatmul.mubr.msk.bf16.vlgmr.msra.gmra.mrb[12].mxu1 %vm2474_vm7, %v2714_v54 }
 0x768   :  { %v2124_v13 = vpop.f32.mrb[12].mxu1 }
 0x769   :  { %v2138_v15 = vadd.f32 %v2136_v12, %v2124_v13  ;;  %v2126_v16 = vpop.f32.mrb[13].mxu1 }
 0x76a   :  { %v2139_v17 = vadd.f32 %v2137_v14, %v2126_v16  ;;  %v2128_v18 = vpop.f32.mrb[14].mxu1 }
 0x76b   :  { %v2140_v19 = vadd.f32 %v2138_v15, %v2962_v41  ;;  %v2129_v61 = vpop.f32.mrb[15].mxu1 }
 0x76c   :  { %v2141_v62 = vadd.f32 %v2139_v17, %v2964_v44 }
 0x76d   :  { %v2144_v33 = vsel %vm2142_vm8, %v2140_v19, 0.0 }
 0x76e   :  { %vm2146_vm10 = vcmp.gt.f32.partialorder %v2144_v33, 1.0  ;;  %v2145_v34 = vsel %vm2143_vm9, %v2141_v62, 0.0 }
 0x76f   :  { %v2476_v54 = vsel %vm2146_vm10, 1.0, %v2713_v51  ;;  %vm2147_vm11 = vcmp.gt.f32.partialorder %v2145_v34, 1.0 }
 0x770   :  { %2153 = vst [vmem:[#allocation12 + $0x70] sm:$0xff] %v2476_v54  ;;  %v2477_v63 = vsel %vm2147_vm11, 1.0, %v2713_v51 }
 0x771   :  { %2154 = vst [vmem:[#allocation12 + $0x78] sm:$0xff] %v2477_v63 }
 0x772   :  { %2685 = shalt.err (!%p2682_p8)
}
 0x773   :  { %s2686_s17 = scalar_lea.hbm %s3291_s4, 2048 }
 0x774   :  { %p2687_p9 = scmp.ne.s32.totalorder %s3291_s4, %s2686_s17  ;;  %p2690_p10 = scmp.lt.u32.totalorder %s2686_s17, %s3291_s4 }
 0x776   :  { %p2692_p11 = pnand %p2690_p10, %p2687_p9 }
 0x778   :  { %2695 = shalt.err (!%p2692_p11)
}
 0x779   :  { %2170 = dma.vmem_to_hbm [thread:$0]  %s2165_s12, 2048, %s3291_s4, [#allocation6], %s2708_s1, %s2708_s1, %s2709_s13  }
 0x77a   :  { %2702 = dma.done.wait [#allocation6], 2048  }
 0x77b   :  { %2703 = vsyncadd [#allocation6], 4294965248 }
 0x77c   :  { %2174 = vsyncpa [#allocation5], 1 }
 0x77d   :  { %2175 = vsyncpa [#allocation8], 1 }
 0x77e   :  { %2176 = vsyncpa [#allocation11], 1 }
 0x77f   :  { %2177 = vsyncpa [#allocation6], 1 }

</bundles_post_ra>
